<compile_context>
chip_gen: v5e
topology: v5e:2x2
jax: 0.10.0
libtpu: 0.0.40
codegen_flags: <defaults>
</compile_context>

<pallas_src>
import functools
import math

import jax
import jax.numpy as jnp
from jax.experimental import pallas as pl
from jax.experimental.pallas import tpu as pltpu


# ---------------------------------------------------------------------------
# Pallas kernel
# ---------------------------------------------------------------------------

def _layer_norm(v, w, b, eps=1e-5):
    mu = jnp.mean(v, axis=-1, keepdims=True)
    var = jnp.mean((v - mu) ** 2, axis=-1, keepdims=True)
    return (v - mu) * jax.lax.rsqrt(var + eps) * w + b


def fused_text_kernel(eot_ref, has_mask_ref, mask_slot_ref,          # scalar prefetch
                      x_ref, causal_ref,
                      ln1_w_ref, ln1_b_ref, wqkv_ref, bqkv_ref, wo_ref, bo_ref,
                      ln2_w_ref, ln2_b_ref, w1_ref, b1_ref, w2_ref, b2_ref,
                      mask_ref, lnf_w_ref, lnf_b_ref, proj_ref,
                      o_ref,
                      x_scr,
                      *, num_heads):
    """grid = (num_batch_tiles, num_layers).

    One grid step = one ResidualAttentionBlock (+ optional learned mask) on a
    (B, L, D) batch tile.  The residual stream stays resident in the VMEM scratch
    across the layer sweep; on the last layer the EOT rows are gathered in-VMEM,
    ln_final + text_projection are applied and only (B, E) is written to HBM.
    """
    del mask_slot_ref                               # consumed by the mask index_map
    n = pl.program_id(0)
    layer = pl.program_id(1)
    last = pl.num_programs(1) - 1
    f32, bf16 = jnp.float32, jnp.bfloat16

    @pl.when(layer == 0)
    def _():
        x_scr[...] = x_ref[...]                     # initialize resident residual stream

    x = x_scr[...]                                  # (B, L, D) f32
    B, L, D = x.shape
    H = num_heads
    Dh = D // H

    # --- attention branch: x = x + out_proj(MHA(LN1(x))), causal ---
    h = _layer_norm(x, ln1_w_ref[...], ln1_b_ref[...])                  # (B, L, D) f32
    hf = h.reshape(B * L, D).astype(bf16)
    # Single lane-dense QKV projection: (B*L, D) @ (D, 3D), f32 accumulation.
    qkv = jnp.dot(hf, wqkv_ref[...], preferred_element_type=f32) + bqkv_ref[...]

    bias = causal_ref[...]                          # (L, L) additive causal bias (0 / -1e30)

    ctx_heads = []
    for hh in range(H):                             # static unroll over heads
        qh = qkv[:, hh * Dh:(hh + 1) * Dh].reshape(B, L, Dh)
        kh = qkv[:, D + hh * Dh:D + (hh + 1) * Dh].reshape(B, L, Dh)
        vh = qkv[:, 2 * D + hh * Dh:2 * D + (hh + 1) * Dh].reshape(B, L, Dh)
        # 1/sqrt(Dh) is folded into the Q weights/bias at pack time.
        s = jnp.einsum('bqd,bkd->bqk', qh.astype(bf16), kh.astype(bf16),
                       preferred_element_type=f32) + bias               # (B, L, L)
        s = s - jnp.max(s, axis=-1, keepdims=True)
        p = jnp.exp(s)
        p = p * pl.reciprocal(jnp.sum(p, axis=-1, keepdims=True), approx=True)
        ctx_heads.append(jnp.einsum('bqk,bkd->bqd', p.astype(bf16), vh.astype(bf16),
                                    preferred_element_type=f32))         # (B, L, Dh)
    # Concatenate heads once, then a single full-depth out-projection matmul.
    ctx = jnp.concatenate(ctx_heads, axis=-1).reshape(B * L, D)
    attn = jnp.dot(ctx.astype(bf16), wo_ref[...],
                   preferred_element_type=f32) + bo_ref[...]             # (B*L, D)
    x = x + attn.reshape(B, L, D)

    # --- MLP branch: x = x + c_proj(QuickGELU(c_fc(LN2(x)))) ---
    h2 = _layer_norm(x, ln2_w_ref[...], ln2_b_ref[...])
    h2f = h2.reshape(B * L, D).astype(bf16)
    m = jnp.dot(h2f, w1_ref[...], preferred_element_type=f32) + b1_ref[...]
    m = m * jax.nn.sigmoid(1.702 * m)               # QuickGELU (CLIP)
    m = jnp.dot(m.astype(bf16), w2_ref[...], preferred_element_type=f32) + b2_ref[...]
    x = x + m.reshape(B, L, D)

    x_scr[...] = x

    # --- post-block learned mask: only where a mask actually exists ---
    @pl.when(has_mask_ref[layer] != 0)
    def _():
        x_scr[...] = x_scr[...] * mask_ref[...]

    # --- final stage fused into the last layer step ---
    @pl.when(layer == last)
    def _():
        xr = x_scr[...]                             # (B, L, D) post-mask residual
        rows = []
        for b in range(B):                          # static unroll over the batch tile
            e = eot_ref[n * B + b]                  # EOT position for this sequence
            sel = jax.lax.broadcasted_iota(jnp.int32, (L, 1), 0) == e
            rows.append(jnp.sum(jnp.where(sel, xr[b], 0.0), axis=0, keepdims=True))
        r = jnp.concatenate(rows, axis=0)           # (B, D) gathered EOT rows
        rn = _layer_norm(r, lnf_w_ref[...], lnf_b_ref[...])
        o_ref[...] = jnp.dot(rn.astype(bf16), proj_ref[...],
                             preferred_element_type=f32)                 # (B, E)


# ---------------------------------------------------------------------------
# Parameter packing (layer stacking, Q-scale folding, bf16 cast, mask indirection)
# ---------------------------------------------------------------------------

_WEIGHT_KEYS = ('ln1_w', 'ln1_b', 'wqkv', 'bqkv', 'wo', 'bo',
                'ln2_w', 'ln2_b', 'w1', 'b1', 'w2', 'b2')


def pack_params(params, num_heads):
    blocks = params['blocks']
    num_layers = len(blocks)
    D = blocks[0]['wqkv'].shape[0]
    Dh = D // num_heads
    L = params['positional_embedding'].shape[0]
    scale = 1.0 / math.sqrt(Dh)
    bf16, f32 = jnp.bfloat16, jnp.float32

    def stack(fn, dtype):
        return jnp.stack([fn(b) for b in blocks], axis=0).astype(dtype)

    def fold_q_scale(a):
        # Fold 1/sqrt(Dh) into the Q third of the fused qkv weight / bias.
        return jnp.concatenate([a[..., :D] * scale, a[..., D:]], axis=-1)

    packed = {
        'ln1_w': stack(lambda b: b['ln1_w'], f32),
        'ln1_b': stack(lambda b: b['ln1_b'], f32),
        'wqkv': stack(lambda b: fold_q_scale(b['wqkv']), bf16),
        'bqkv': stack(lambda b: fold_q_scale(b['bqkv']), f32),
        'wo': stack(lambda b: b['wo'], bf16),
        'bo': stack(lambda b: b['bo'], f32),
        'ln2_w': stack(lambda b: b['ln2_w'], f32),
        'ln2_b': stack(lambda b: b['ln2_b'], f32),
        'w1': stack(lambda b: b['w1'], bf16),
        'b1': stack(lambda b: b['b1'], f32),
        'w2': stack(lambda b: b['w2'], bf16),
        'b2': stack(lambda b: b['b2'], f32),
    }

    # Only actually-masked layers are packed; unmasked layers point at the previous
    # slot (so the resident block is not re-DMA'd) and are skipped via has_mask.
    mask_list, slots, flags = [], [], []
    for i in range(num_layers):
        if i in params['masks']:
            slots.append(len(mask_list))
            mask_list.append(params['masks'][i].astype(f32))
            flags.append(1)
        else:
            slots.append(max(len(mask_list) - 1, 0))
            flags.append(0)
    if not mask_list:
        mask_list = [jnp.ones((L, D), f32)]
    packed['masks'] = jnp.stack(mask_list, axis=0)
    packed['has_mask'] = jnp.array(flags, jnp.int32)
    packed['mask_slot'] = jnp.array(slots, jnp.int32)
    return packed


# ---------------------------------------------------------------------------
# Wrapper (pallas_call plumbing)
# ---------------------------------------------------------------------------

def run_transformer(x, packed, ln_final_w, ln_final_b, text_proj, eot_idx,
                    num_heads, batch_block=None):
    N, L, D = x.shape
    E = text_proj.shape[1]
    num_layers = packed['wqkv'].shape[0]
    # batch_block: v5e/v6e -> one maximal tile (default); v7x -> pass N//2 or less so
    # the "parallel" batch axis has >= 2 tiles for the 2 TensorCores.
    B = batch_block if batch_block is not None else N
    assert N % B == 0, (N, B)
    assert D % num_heads == 0

    # Precomputed additive causal bias, streamed once (constant index_map).
    causal = jnp.where(jnp.tril(jnp.ones((L, L), bool)), 0.0, -1e30).astype(jnp.float32)

    weights = [packed[k] for k in _WEIGHT_KEYS]

    def layer_spec(a):
        zeros = (0,) * (a.ndim - 1)
        return pl.BlockSpec((None,) + tuple(a.shape[1:]),
                            lambda n, l, eot, hm, ms, _z=zeros: (l,) + _z)

    def const_spec(a):
        zeros = (0,) * a.ndim
        return pl.BlockSpec(tuple(a.shape),
                            lambda n, l, eot, hm, ms, _z=zeros: _z)

    mask_spec = pl.BlockSpec((None, L, D),
                             lambda n, l, eot, hm, ms: (ms[l], 0, 0))

    in_specs = ([pl.BlockSpec((B, L, D), lambda n, l, eot, hm, ms: (n, 0, 0)),
                 const_spec(causal)] +
                [layer_spec(a) for a in weights] +
                [mask_spec,
                 const_spec(ln_final_w), const_spec(ln_final_b), const_spec(text_proj)])

    gs = pltpu.PrefetchScalarGridSpec(
        num_scalar_prefetch=3,
        grid=(N // B, num_layers),
        in_specs=in_specs,
        out_specs=pl.BlockSpec((B, E), lambda n, l, eot, hm, ms: (n, 0)),
        scratch_shapes=[pltpu.VMEM((B, L, D), jnp.float32)],
    )
    return pl.pallas_call(
        functools.partial(fused_text_kernel, num_heads=num_heads),
        grid_spec=gs,
        out_shape=jax.ShapeDtypeStruct((N, E), jnp.float32),
        compiler_params=pltpu.CompilerParams(
            dimension_semantics=("parallel", "arbitrary"),
            vmem_limit_bytes=64 * 1024 * 1024),
    )(eot_idx, packed['has_mask'], packed['mask_slot'],
      x, causal, *weights, packed['masks'], ln_final_w, ln_final_b, text_proj)


def masked_text_transformer_forward(text_ids, params, num_heads, batch_block=None):
    # embed_text: token-embedding lookup + positional embedding (plain-JAX glue).
    x = jnp.take(params['token_embedding'], text_ids, axis=0) + params['positional_embedding']
    x = x.astype(jnp.float32)
    # EOT token = position of the max token id (as in CLIP).
    eot_idx = jnp.argmax(text_ids, axis=-1).astype(jnp.int32)
    packed = pack_params(params, num_heads)
    return run_transformer(x, packed,
                           params['ln_final_w'].astype(jnp.float32),
                           params['ln_final_b'].astype(jnp.float32),
                           params['text_projection'].astype(jnp.bfloat16),
                           eot_idx, num_heads, batch_block)


# ---------------------------------------------------------------------------
# Deterministic parameter init (synthetic; matches module shapes, small config)
# ---------------------------------------------------------------------------

def init_params(key, vocab, L, D, num_layers, E, blocks_to_mask):
    keys = jax.random.split(key, 4 + num_layers)
    params = {
        'token_embedding': jax.random.normal(keys[0], (vocab, D), jnp.float32) * 0.02,
        'positional_embedding': jax.random.normal(keys[1], (L, D), jnp.float32) * 0.01,
        'ln_final_w': jnp.ones((1, D), jnp.float32),
        'ln_final_b': jnp.zeros((1, D), jnp.float32),
        'text_projection': jax.random.normal(keys[2], (D, E), jnp.float32) * (D ** -0.5),
    }
    blocks = []
    for i in range(num_layers):
        k = jax.random.split(keys[4 + i], 8)
        blocks.append(dict(
            ln1_w=jnp.ones((1, D), jnp.float32),
            ln1_b=jnp.zeros((1, D), jnp.float32),
            wqkv=jax.random.normal(k[0], (D, 3 * D), jnp.float32) * (D ** -0.5),
            bqkv=jax.random.normal(k[1], (1, 3 * D), jnp.float32) * 0.01,
            wo=jax.random.normal(k[2], (D, D), jnp.float32) * (D ** -0.5),
            bo=jax.random.normal(k[3], (1, D), jnp.float32) * 0.01,
            ln2_w=jnp.ones((1, D), jnp.float32),
            ln2_b=jnp.zeros((1, D), jnp.float32),
            w1=jax.random.normal(k[4], (D, 4 * D), jnp.float32) * (D ** -0.5),
            b1=jax.random.normal(k[5], (1, 4 * D), jnp.float32) * 0.01,
            w2=jax.random.normal(k[6], (4 * D, D), jnp.float32) * ((4 * D) ** -0.5),
            b2=jax.random.normal(k[7], (1, D), jnp.float32) * 0.01,
        ))
    params['blocks'] = blocks
    # Module initialises masks to ones (shape (seq, 1, width)); we perturb them so the
    # mask-multiply path is actually exercised by the correctness check.  Stored as
    # (L, D): the size-1 batch dim of the (L, N, D) layout broadcasts in (N, L, D) too.
    mkeys = jax.random.split(keys[3], max(len(blocks_to_mask), 1))
    params['masks'] = {b: 1.0 + 0.1 * jax.random.normal(mkeys[j], (L, D), jnp.float32)
                       for j, b in enumerate(blocks_to_mask)}
    return params


# ---------------------------------------------------------------------------
# Pure-JAX reference (same precision policy: bf16 matmul operands, f32 accumulation)
# ---------------------------------------------------------------------------

def reference_forward(text_ids, params, num_heads):
    f32, bf16 = jnp.float32, jnp.bfloat16

    def mm(a, b):
        return jnp.dot(a.astype(bf16), b.astype(bf16), preferred_element_type=f32)

    def ln(v, w, b):
        mu = v.mean(-1, keepdims=True)
        var = ((v - mu) ** 2).mean(-1, keepdims=True)
        return (v - mu) / jnp.sqrt(var + 1e-5) * w + b

    x = params['token_embedding'][text_ids] + params['positional_embedding']
    x = x.astype(f32)
    N, L, D = x.shape
    H = num_heads
    Dh = D // H
    causal = jnp.tril(jnp.ones((L, L), bool))
    for i, blk in enumerate(params['blocks']):
        h = ln(x, blk['ln1_w'], blk['ln1_b'])
        qkv = mm(h, blk['wqkv']) + blk['bqkv']
        q, k, v = jnp.split(qkv, 3, axis=-1)
        q = q.reshape(N, L, H, Dh).transpose(0, 2, 1, 3)
        k = k.reshape(N, L, H, Dh).transpose(0, 2, 1, 3)
        v = v.reshape(N, L, H, Dh).transpose(0, 2, 1, 3)
        s = jnp.einsum('nhqd,nhkd->nhqk', q.astype(bf16), k.astype(bf16),
                       preferred_element_type=f32) / math.sqrt(Dh)
        s = jnp.where(causal, s, -jnp.inf)
        p = jax.nn.softmax(s, axis=-1)
        a = jnp.einsum('nhqk,nhkd->nhqd', p.astype(bf16), v.astype(bf16),
                       preferred_element_type=f32)
        a = a.transpose(0, 2, 1, 3).reshape(N, L, D)
        x = x + mm(a, blk['wo']) + blk['bo']
        h2 = ln(x, blk['ln2_w'], blk['ln2_b'])
        m = mm(h2, blk['w1']) + blk['b1']
        m = m * jax.nn.sigmoid(1.702 * m)
        x = x + mm(m, blk['w2']) + blk['b2']
        if i in params['masks']:
            x = x * params['masks'][i][None]
    xn = ln(x, params['ln_final_w'], params['ln_final_b'])
    eot = jnp.argmax(text_ids, axis=-1)
    return mm(xn[jnp.arange(N), eot], params['text_projection'])


# ---------------------------------------------------------------------------
# Main
# ---------------------------------------------------------------------------

if __name__ == "__main__":
    # Lane-dense small config: D and E multiples of 128.
    VOCAB, N, L, D, HEADS, E, LAYERS = 64, 2, 8, 128, 4, 128, 3
    blocks_to_mask = [0, 2]

    key = jax.random.PRNGKey(0)
    kp, kt = jax.random.split(key)
    params = init_params(kp, VOCAB, L, D, LAYERS, E, blocks_to_mask)

    # Token ids; the highest-id token acts as EOT (as in CLIP), so argmax finds it.
    text = jax.random.randint(kt, (N, L), 1, VOCAB - 1, dtype=jnp.int32)
    text = text.at[0, 5].set(VOCAB - 1).at[1, 3].set(VOCAB - 1)

    out = jax.block_until_ready(masked_text_transformer_forward(text, params, HEADS))
    assert out.shape == (N, E)

    ref = reference_forward(text, params, HEADS)
    max_err = float(jnp.max(jnp.abs(out - ref)))
    tol = 2e-2 * float(jnp.max(jnp.abs(ref))) + 1e-3   # bf16-matmul-level agreement
    assert max_err <= tol, (max_err, tol)
    print("KERNEL_OK")
</pallas_src>

<mosaic_0001>
module attributes {stable_mosaic.version = 11 : i64} {
  func.func @fused_text_kernel(%arg0: i32, %arg1: i32, %arg2: memref<2xi32, #tpu.memory_space<smem>>, %arg3: memref<3xi32, #tpu.memory_space<smem>>, %arg4: memref<3xi32, #tpu.memory_space<smem>>, %arg5: memref<2x8x128xf32, #tpu.memory_space<vmem>>, %arg6: memref<8x8xf32, #tpu.memory_space<vmem>>, %arg7: memref<1x1x128xf32, #tpu.memory_space<vmem>>, %arg8: memref<1x1x128xf32, #tpu.memory_space<vmem>>, %arg9: memref<1x128x384xbf16, #tpu.memory_space<vmem>>, %arg10: memref<1x1x384xf32, #tpu.memory_space<vmem>>, %arg11: memref<1x128x128xbf16, #tpu.memory_space<vmem>>, %arg12: memref<1x1x128xf32, #tpu.memory_space<vmem>>, %arg13: memref<1x1x128xf32, #tpu.memory_space<vmem>>, %arg14: memref<1x1x128xf32, #tpu.memory_space<vmem>>, %arg15: memref<1x128x512xbf16, #tpu.memory_space<vmem>>, %arg16: memref<1x1x512xf32, #tpu.memory_space<vmem>>, %arg17: memref<1x512x128xbf16, #tpu.memory_space<vmem>>, %arg18: memref<1x1x128xf32, #tpu.memory_space<vmem>>, %arg19: memref<1x8x128xf32, #tpu.memory_space<vmem>>, %arg20: memref<1x128xf32, #tpu.memory_space<vmem>>, %arg21: memref<1x128xf32, #tpu.memory_space<vmem>>, %arg22: memref<128x128xbf16, #tpu.memory_space<vmem>>, %arg23: memref<2x128xf32, #tpu.memory_space<vmem>>, %arg24: memref<2x8x128xf32, #tpu.memory_space<vmem>>) attributes {dimension_semantics = [#tpu.dimension_semantics<parallel>, #tpu.dimension_semantics<arbitrary>], iteration_bounds = array<i64: 1, 3>, scalar_prefetch = 3 : i64, scratch_operands = 1 : i64, tpu.core_type = #tpu.core_type<tc>, window_params = [{transform_indices = @transform_0, window_bounds = array<i64: 2, 8, 128>}, {pipeline_mode = #tpu.pipeline_mode<synchronous>, transform_indices = @transform_1, window_bounds = array<i64: 8, 8>}, {transform_indices = @transform_2, window_bounds = array<i64: 1, 1, 128>}, {transform_indices = @transform_3, window_bounds = array<i64: 1, 1, 128>}, {transform_indices = @transform_4, window_bounds = array<i64: 1, 128, 384>}, {transform_indices = @transform_5, window_bounds = array<i64: 1, 1, 384>}, {transform_indices = @transform_6, window_bounds = array<i64: 1, 128, 128>}, {transform_indices = @transform_7, window_bounds = array<i64: 1, 1, 128>}, {transform_indices = @transform_8, window_bounds = array<i64: 1, 1, 128>}, {transform_indices = @transform_9, window_bounds = array<i64: 1, 1, 128>}, {transform_indices = @transform_10, window_bounds = array<i64: 1, 128, 512>}, {transform_indices = @transform_11, window_bounds = array<i64: 1, 1, 512>}, {transform_indices = @transform_12, window_bounds = array<i64: 1, 512, 128>}, {transform_indices = @transform_13, window_bounds = array<i64: 1, 1, 128>}, {transform_indices = @transform_14, window_bounds = array<i64: 1, 8, 128>}, {pipeline_mode = #tpu.pipeline_mode<synchronous>, transform_indices = @transform_15, window_bounds = array<i64: 1, 128>}, {pipeline_mode = #tpu.pipeline_mode<synchronous>, transform_indices = @transform_16, window_bounds = array<i64: 1, 128>}, {pipeline_mode = #tpu.pipeline_mode<synchronous>, transform_indices = @transform_17, window_bounds = array<i64: 128, 128>}, {transform_indices = @transform_18, window_bounds = array<i64: 2, 128>}]} {
    %c0_i32 = arith.constant 0 : i32
    %0 = arith.cmpi eq, %arg1, %c0_i32 : i32
    %1 = arith.extui %0 : i1 to i32
    %c0_i32_0 = arith.constant 0 : i32
    %2 = arith.cmpi ne, %1, %c0_i32_0 : i32
    scf.if %2 {
      %c0_78 = arith.constant 0 : index
      %c0_79 = arith.constant 0 : index
      %c0_80 = arith.constant 0 : index
      %218 = vector.load %arg5[%c0_78, %c0_79, %c0_80] : memref<2x8x128xf32, #tpu.memory_space<vmem>>, vector<2x8x128xf32>
      %c0_81 = arith.constant 0 : index
      %c0_82 = arith.constant 0 : index
      %c0_83 = arith.constant 0 : index
      %219 = vector.load %arg24[%c0_81, %c0_82, %c0_83] : memref<2x8x128xf32, #tpu.memory_space<vmem>>, vector<2x8x128xf32>
      tpu.vector_store %arg24[%c0_81, %c0_82, %c0_83], %218 {strides = array<i32>} : memref<2x8x128xf32, #tpu.memory_space<vmem>>, vector<2x8x128xf32>,
    } else {
    }
    %c0 = arith.constant 0 : index
    %c0_1 = arith.constant 0 : index
    %c0_2 = arith.constant 0 : index
    %3 = vector.load %arg24[%c0, %c0_1, %c0_2] : memref<2x8x128xf32, #tpu.memory_space<vmem>>, vector<2x8x128xf32>
    %c0_3 = arith.constant 0 : index
    %c0_4 = arith.constant 0 : index
    %c0_5 = arith.constant 0 : index
    %4 = vector.load %arg7[%c0_3, %c0_4, %c0_5] : memref<1x1x128xf32, #tpu.memory_space<vmem>>, vector<1x1x128xf32>
    %5 = vector.shape_cast %4 : vector<1x1x128xf32> to vector<1x128xf32>
    %c0_6 = arith.constant 0 : index
    %c0_7 = arith.constant 0 : index
    %c0_8 = arith.constant 0 : index
    %6 = vector.load %arg8[%c0_6, %c0_7, %c0_8] : memref<1x1x128xf32, #tpu.memory_space<vmem>>, vector<1x1x128xf32>
    %7 = vector.shape_cast %6 : vector<1x1x128xf32> to vector<1x128xf32>
    %cst = arith.constant dense<0.000000e+00> : vector<2x8xf32>
    %8 = vector.multi_reduction <add>, %3, %cst [2] : vector<2x8x128xf32> to vector<2x8xf32>
    %9 = vector.shape_cast %8 : vector<2x8xf32> to vector<2x8x1xf32>
    %cst_9 = arith.constant 1.280000e+02 : f32
    %10 = vector.broadcast %cst_9 : f32 to vector<2x8x1xf32>
    %11 = arith.divf %9, %10 : vector<2x8x1xf32>
    %12 = vector.broadcast %11 : vector<2x8x1xf32> to vector<2x8x128xf32>
    %13 = arith.subf %3, %12 : vector<2x8x128xf32>
    %14 = arith.mulf %13, %13 : vector<2x8x128xf32>
    %cst_10 = arith.constant dense<0.000000e+00> : vector<2x8xf32>
    %15 = vector.multi_reduction <add>, %14, %cst_10 [2] : vector<2x8x128xf32> to vector<2x8xf32>
    %16 = vector.shape_cast %15 : vector<2x8xf32> to vector<2x8x1xf32>
    %cst_11 = arith.constant 1.280000e+02 : f32
    %17 = vector.broadcast %cst_11 : f32 to vector<2x8x1xf32>
    %18 = arith.divf %16, %17 : vector<2x8x1xf32>
    %19 = vector.broadcast %11 : vector<2x8x1xf32> to vector<2x8x128xf32>
    %20 = arith.subf %3, %19 : vector<2x8x128xf32>
    %cst_12 = arith.constant 9.99999974E-6 : f32
    %21 = vector.broadcast %cst_12 : f32 to vector<2x8x1xf32>
    %22 = arith.addf %18, %21 : vector<2x8x1xf32>
    %23 = math.rsqrt %22 : vector<2x8x1xf32>
    %24 = vector.broadcast %23 : vector<2x8x1xf32> to vector<2x8x128xf32>
    %25 = arith.mulf %20, %24 : vector<2x8x128xf32>
    %26 = vector.shape_cast %5 : vector<1x128xf32> to vector<1x1x128xf32>
    %27 = vector.broadcast %26 : vector<1x1x128xf32> to vector<2x8x128xf32>
    %28 = arith.mulf %25, %27 : vector<2x8x128xf32>
    %29 = vector.shape_cast %7 : vector<1x128xf32> to vector<1x1x128xf32>
    %30 = vector.broadcast %29 : vector<1x1x128xf32> to vector<2x8x128xf32>
    %31 = arith.addf %28, %30 : vector<2x8x128xf32>
    %32 = vector.shape_cast %31 : vector<2x8x128xf32> to vector<16x128xf32>
    %33 = arith.truncf %32 : vector<16x128xf32> to vector<16x128xbf16>
    %c0_13 = arith.constant 0 : index
    %c0_14 = arith.constant 0 : index
    %c0_15 = arith.constant 0 : index
    %34 = vector.load %arg9[%c0_13, %c0_14, %c0_15] : memref<1x128x384xbf16, #tpu.memory_space<vmem>>, vector<1x128x384xbf16>
    %35 = vector.shape_cast %34 : vector<1x128x384xbf16> to vector<128x384xbf16>
    %cst_16 = arith.constant dense<0.000000e+00> : vector<16x384xf32>
    %36 = tpu.matmul %33, %35, %cst_16 {dimension_numbers = #tpu.dot_dimension_numbers<[1], [0], [0], [1], [0, 0, 1, 1], [], []>} : vector<16x128xbf16>, vector<128x384xbf16>, vector<16x384xf32> -> vector<16x384xf32>
    %c0_17 = arith.constant 0 : index
    %c0_18 = arith.constant 0 : index
    %c0_19 = arith.constant 0 : index
    %37 = vector.load %arg10[%c0_17, %c0_18, %c0_19] : memref<1x1x384xf32, #tpu.memory_space<vmem>>, vector<1x1x384xf32>
    %38 = vector.shape_cast %37 : vector<1x1x384xf32> to vector<1x384xf32>
    %39 = vector.broadcast %38 : vector<1x384xf32> to vector<16x384xf32>
    %40 = arith.addf %36, %39 : vector<16x384xf32>
    %c0_20 = arith.constant 0 : index
    %c0_21 = arith.constant 0 : index
    %41 = vector.load %arg6[%c0_20, %c0_21] : memref<8x8xf32, #tpu.memory_space<vmem>>, vector<8x8xf32>
    %42 = vector.extract_strided_slice %40 {offsets = [0, 0], sizes = [16, 32], strides = [1, 1]} : vector<16x384xf32> to vector<16x32xf32>
    %43 = vector.shape_cast %42 : vector<16x32xf32> to vector<2x8x32xf32>
    %44 = vector.extract_strided_slice %40 {offsets = [0, 128], sizes = [16, 32], strides = [1, 1]} : vector<16x384xf32> to vector<16x32xf32>
    %45 = vector.shape_cast %44 : vector<16x32xf32> to vector<2x8x32xf32>
    %46 = vector.extract_strided_slice %40 {offsets = [0, 256], sizes = [16, 32], strides = [1, 1]} : vector<16x384xf32> to vector<16x32xf32>
    %47 = vector.shape_cast %46 : vector<16x32xf32> to vector<2x8x32xf32>
    %48 = arith.truncf %43 : vector<2x8x32xf32> to vector<2x8x32xbf16>
    %49 = arith.truncf %45 : vector<2x8x32xf32> to vector<2x8x32xbf16>
    "tpu.trace_start"() <{level = 10 : i32, message = "bqd,bkd->bqk"}> : () -> ()
    %cst_22 = arith.constant dense<0.000000e+00> : vector<2x8x8xf32>
    %50 = tpu.matmul %48, %49, %cst_22 {dimension_numbers = #tpu.dot_dimension_numbers<[2], [2], [1], [1], [0, 0, 0, 1, 1, 1], [0], [0]>} : vector<2x8x32xbf16>, vector<2x8x32xbf16>, vector<2x8x8xf32> -> vector<2x8x8xf32>
    "tpu.trace_stop"() : () -> ()
    %51 = vector.shape_cast %41 : vector<8x8xf32> to vector<1x8x8xf32>
    %52 = vector.broadcast %51 : vector<1x8x8xf32> to vector<2x8x8xf32>
    %53 = arith.addf %50, %52 : vector<2x8x8xf32>
    %cst_23 = arith.constant dense<0xFF800000> : vector<2x8xf32>
    %54 = vector.multi_reduction <maximumf>, %53, %cst_23 [2] : vector<2x8x8xf32> to vector<2x8xf32>
    %55 = vector.shape_cast %54 : vector<2x8xf32> to vector<2x8x1xf32>
    %56 = vector.broadcast %55 : vector<2x8x1xf32> to vector<2x8x8xf32>
    %57 = arith.subf %53, %56 : vector<2x8x8xf32>
    %58 = math.exp %57 : vector<2x8x8xf32>
    %cst_24 = arith.constant dense<0.000000e+00> : vector<2x8xf32>
    %59 = vector.multi_reduction <add>, %58, %cst_24 [2] : vector<2x8x8xf32> to vector<2x8xf32>
    %60 = vector.shape_cast %59 : vector<2x8xf32> to vector<2x8x1xf32>
    %61 = tpu.reciprocal %60 {approx = true} : vector<2x8x1xf32> -> vector<2x8x1xf32>
    %62 = vector.broadcast %61 : vector<2x8x1xf32> to vector<2x8x8xf32>
    %63 = arith.mulf %58, %62 : vector<2x8x8xf32>
    %64 = arith.truncf %63 : vector<2x8x8xf32> to vector<2x8x8xbf16>
    %65 = arith.truncf %47 : vector<2x8x32xf32> to vector<2x8x32xbf16>
    "tpu.trace_start"() <{level = 10 : i32, message = "bqk,bkd->bqd"}> : () -> ()
    %cst_25 = arith.constant dense<0.000000e+00> : vector<2x8x32xf32>
    %66 = tpu.matmul %64, %65, %cst_25 {dimension_numbers = #tpu.dot_dimension_numbers<[2], [1], [1], [2], [0, 0, 0, 1, 1, 2], [0], [0]>} : vector<2x8x8xbf16>, vector<2x8x32xbf16>, vector<2x8x32xf32> -> vector<2x8x32xf32>
    "tpu.trace_stop"() : () -> ()
    %67 = vector.extract_strided_slice %40 {offsets = [0, 32], sizes = [16, 32], strides = [1, 1]} : vector<16x384xf32> to vector<16x32xf32>
    %68 = vector.shape_cast %67 : vector<16x32xf32> to vector<2x8x32xf32>
    %69 = vector.extract_strided_slice %40 {offsets = [0, 160], sizes = [16, 32], strides = [1, 1]} : vector<16x384xf32> to vector<16x32xf32>
    %70 = vector.shape_cast %69 : vector<16x32xf32> to vector<2x8x32xf32>
    %71 = vector.extract_strided_slice %40 {offsets = [0, 288], sizes = [16, 32], strides = [1, 1]} : vector<16x384xf32> to vector<16x32xf32>
    %72 = vector.shape_cast %71 : vector<16x32xf32> to vector<2x8x32xf32>
    %73 = arith.truncf %68 : vector<2x8x32xf32> to vector<2x8x32xbf16>
    %74 = arith.truncf %70 : vector<2x8x32xf32> to vector<2x8x32xbf16>
    "tpu.trace_start"() <{level = 10 : i32, message = "bqd,bkd->bqk"}> : () -> ()
    %cst_26 = arith.constant dense<0.000000e+00> : vector<2x8x8xf32>
    %75 = tpu.matmul %73, %74, %cst_26 {dimension_numbers = #tpu.dot_dimension_numbers<[2], [2], [1], [1], [0, 0, 0, 1, 1, 1], [0], [0]>} : vector<2x8x32xbf16>, vector<2x8x32xbf16>, vector<2x8x8xf32> -> vector<2x8x8xf32>
    "tpu.trace_stop"() : () -> ()
    %76 = vector.shape_cast %41 : vector<8x8xf32> to vector<1x8x8xf32>
    %77 = vector.broadcast %76 : vector<1x8x8xf32> to vector<2x8x8xf32>
    %78 = arith.addf %75, %77 : vector<2x8x8xf32>
    %cst_27 = arith.constant dense<0xFF800000> : vector<2x8xf32>
    %79 = vector.multi_reduction <maximumf>, %78, %cst_27 [2] : vector<2x8x8xf32> to vector<2x8xf32>
    %80 = vector.shape_cast %79 : vector<2x8xf32> to vector<2x8x1xf32>
    %81 = vector.broadcast %80 : vector<2x8x1xf32> to vector<2x8x8xf32>
    %82 = arith.subf %78, %81 : vector<2x8x8xf32>
    %83 = math.exp %82 : vector<2x8x8xf32>
    %cst_28 = arith.constant dense<0.000000e+00> : vector<2x8xf32>
    %84 = vector.multi_reduction <add>, %83, %cst_28 [2] : vector<2x8x8xf32> to vector<2x8xf32>
    %85 = vector.shape_cast %84 : vector<2x8xf32> to vector<2x8x1xf32>
    %86 = tpu.reciprocal %85 {approx = true} : vector<2x8x1xf32> -> vector<2x8x1xf32>
    %87 = vector.broadcast %86 : vector<2x8x1xf32> to vector<2x8x8xf32>
    %88 = arith.mulf %83, %87 : vector<2x8x8xf32>
    %89 = arith.truncf %88 : vector<2x8x8xf32> to vector<2x8x8xbf16>
    %90 = arith.truncf %72 : vector<2x8x32xf32> to vector<2x8x32xbf16>
    "tpu.trace_start"() <{level = 10 : i32, message = "bqk,bkd->bqd"}> : () -> ()
    %cst_29 = arith.constant dense<0.000000e+00> : vector<2x8x32xf32>
    %91 = tpu.matmul %89, %90, %cst_29 {dimension_numbers = #tpu.dot_dimension_numbers<[2], [1], [1], [2], [0, 0, 0, 1, 1, 2], [0], [0]>} : vector<2x8x8xbf16>, vector<2x8x32xbf16>, vector<2x8x32xf32> -> vector<2x8x32xf32>
    "tpu.trace_stop"() : () -> ()
    %92 = vector.extract_strided_slice %40 {offsets = [0, 64], sizes = [16, 32], strides = [1, 1]} : vector<16x384xf32> to vector<16x32xf32>
    %93 = vector.shape_cast %92 : vector<16x32xf32> to vector<2x8x32xf32>
    %94 = vector.extract_strided_slice %40 {offsets = [0, 192], sizes = [16, 32], strides = [1, 1]} : vector<16x384xf32> to vector<16x32xf32>
    %95 = vector.shape_cast %94 : vector<16x32xf32> to vector<2x8x32xf32>
    %96 = vector.extract_strided_slice %40 {offsets = [0, 320], sizes = [16, 32], strides = [1, 1]} : vector<16x384xf32> to vector<16x32xf32>
    %97 = vector.shape_cast %96 : vector<16x32xf32> to vector<2x8x32xf32>
    %98 = arith.truncf %93 : vector<2x8x32xf32> to vector<2x8x32xbf16>
    %99 = arith.truncf %95 : vector<2x8x32xf32> to vector<2x8x32xbf16>
    "tpu.trace_start"() <{level = 10 : i32, message = "bqd,bkd->bqk"}> : () -> ()
    %cst_30 = arith.constant dense<0.000000e+00> : vector<2x8x8xf32>
    %100 = tpu.matmul %98, %99, %cst_30 {dimension_numbers = #tpu.dot_dimension_numbers<[2], [2], [1], [1], [0, 0, 0, 1, 1, 1], [0], [0]>} : vector<2x8x32xbf16>, vector<2x8x32xbf16>, vector<2x8x8xf32> -> vector<2x8x8xf32>
    "tpu.trace_stop"() : () -> ()
    %101 = vector.shape_cast %41 : vector<8x8xf32> to vector<1x8x8xf32>
    %102 = vector.broadcast %101 : vector<1x8x8xf32> to vector<2x8x8xf32>
    %103 = arith.addf %100, %102 : vector<2x8x8xf32>
    %cst_31 = arith.constant dense<0xFF800000> : vector<2x8xf32>
    %104 = vector.multi_reduction <maximumf>, %103, %cst_31 [2] : vector<2x8x8xf32> to vector<2x8xf32>
    %105 = vector.shape_cast %104 : vector<2x8xf32> to vector<2x8x1xf32>
    %106 = vector.broadcast %105 : vector<2x8x1xf32> to vector<2x8x8xf32>
    %107 = arith.subf %103, %106 : vector<2x8x8xf32>
    %108 = math.exp %107 : vector<2x8x8xf32>
    %cst_32 = arith.constant dense<0.000000e+00> : vector<2x8xf32>
    %109 = vector.multi_reduction <add>, %108, %cst_32 [2] : vector<2x8x8xf32> to vector<2x8xf32>
    %110 = vector.shape_cast %109 : vector<2x8xf32> to vector<2x8x1xf32>
    %111 = tpu.reciprocal %110 {approx = true} : vector<2x8x1xf32> -> vector<2x8x1xf32>
    %112 = vector.broadcast %111 : vector<2x8x1xf32> to vector<2x8x8xf32>
    %113 = arith.mulf %108, %112 : vector<2x8x8xf32>
    %114 = arith.truncf %113 : vector<2x8x8xf32> to vector<2x8x8xbf16>
    %115 = arith.truncf %97 : vector<2x8x32xf32> to vector<2x8x32xbf16>
    "tpu.trace_start"() <{level = 10 : i32, message = "bqk,bkd->bqd"}> : () -> ()
    %cst_33 = arith.constant dense<0.000000e+00> : vector<2x8x32xf32>
    %116 = tpu.matmul %114, %115, %cst_33 {dimension_numbers = #tpu.dot_dimension_numbers<[2], [1], [1], [2], [0, 0, 0, 1, 1, 2], [0], [0]>} : vector<2x8x8xbf16>, vector<2x8x32xbf16>, vector<2x8x32xf32> -> vector<2x8x32xf32>
    "tpu.trace_stop"() : () -> ()
    %117 = vector.extract_strided_slice %40 {offsets = [0, 96], sizes = [16, 32], strides = [1, 1]} : vector<16x384xf32> to vector<16x32xf32>
    %118 = vector.shape_cast %117 : vector<16x32xf32> to vector<2x8x32xf32>
    %119 = vector.extract_strided_slice %40 {offsets = [0, 224], sizes = [16, 32], strides = [1, 1]} : vector<16x384xf32> to vector<16x32xf32>
    %120 = vector.shape_cast %119 : vector<16x32xf32> to vector<2x8x32xf32>
    %121 = vector.extract_strided_slice %40 {offsets = [0, 352], sizes = [16, 32], strides = [1, 1]} : vector<16x384xf32> to vector<16x32xf32>
    %122 = vector.shape_cast %121 : vector<16x32xf32> to vector<2x8x32xf32>
    %123 = arith.truncf %118 : vector<2x8x32xf32> to vector<2x8x32xbf16>
    %124 = arith.truncf %120 : vector<2x8x32xf32> to vector<2x8x32xbf16>
    "tpu.trace_start"() <{level = 10 : i32, message = "bqd,bkd->bqk"}> : () -> ()
    %cst_34 = arith.constant dense<0.000000e+00> : vector<2x8x8xf32>
    %125 = tpu.matmul %123, %124, %cst_34 {dimension_numbers = #tpu.dot_dimension_numbers<[2], [2], [1], [1], [0, 0, 0, 1, 1, 1], [0], [0]>} : vector<2x8x32xbf16>, vector<2x8x32xbf16>, vector<2x8x8xf32> -> vector<2x8x8xf32>
    "tpu.trace_stop"() : () -> ()
    %126 = vector.shape_cast %41 : vector<8x8xf32> to vector<1x8x8xf32>
    %127 = vector.broadcast %126 : vector<1x8x8xf32> to vector<2x8x8xf32>
    %128 = arith.addf %125, %127 : vector<2x8x8xf32>
    %cst_35 = arith.constant dense<0xFF800000> : vector<2x8xf32>
    %129 = vector.multi_reduction <maximumf>, %128, %cst_35 [2] : vector<2x8x8xf32> to vector<2x8xf32>
    %130 = vector.shape_cast %129 : vector<2x8xf32> to vector<2x8x1xf32>
    %131 = vector.broadcast %130 : vector<2x8x1xf32> to vector<2x8x8xf32>
    %132 = arith.subf %128, %131 : vector<2x8x8xf32>
    %133 = math.exp %132 : vector<2x8x8xf32>
    %cst_36 = arith.constant dense<0.000000e+00> : vector<2x8xf32>
    %134 = vector.multi_reduction <add>, %133, %cst_36 [2] : vector<2x8x8xf32> to vector<2x8xf32>
    %135 = vector.shape_cast %134 : vector<2x8xf32> to vector<2x8x1xf32>
    %136 = tpu.reciprocal %135 {approx = true} : vector<2x8x1xf32> -> vector<2x8x1xf32>
    %137 = vector.broadcast %136 : vector<2x8x1xf32> to vector<2x8x8xf32>
    %138 = arith.mulf %133, %137 : vector<2x8x8xf32>
    %139 = arith.truncf %138 : vector<2x8x8xf32> to vector<2x8x8xbf16>
    %140 = arith.truncf %122 : vector<2x8x32xf32> to vector<2x8x32xbf16>
    "tpu.trace_start"() <{level = 10 : i32, message = "bqk,bkd->bqd"}> : () -> ()
    %cst_37 = arith.constant dense<0.000000e+00> : vector<2x8x32xf32>
    %141 = tpu.matmul %139, %140, %cst_37 {dimension_numbers = #tpu.dot_dimension_numbers<[2], [1], [1], [2], [0, 0, 0, 1, 1, 2], [0], [0]>} : vector<2x8x8xbf16>, vector<2x8x32xbf16>, vector<2x8x32xf32> -> vector<2x8x32xf32>
    "tpu.trace_stop"() : () -> ()
    %142 = tpu.concatenate %66, %91, %116, %141 in 2 : vector<2x8x32xf32>, vector<2x8x32xf32>, vector<2x8x32xf32>, vector<2x8x32xf32> -> vector<2x8x128xf32>
    %143 = vector.shape_cast %142 : vector<2x8x128xf32> to vector<16x128xf32>
    %144 = arith.truncf %143 : vector<16x128xf32> to vector<16x128xbf16>
    %c0_38 = arith.constant 0 : index
    %c0_39 = arith.constant 0 : index
    %c0_40 = arith.constant 0 : index
    %145 = vector.load %arg11[%c0_38, %c0_39, %c0_40] : memref<1x128x128xbf16, #tpu.memory_space<vmem>>, vector<1x128x128xbf16>
    %146 = vector.shape_cast %145 : vector<1x128x128xbf16> to vector<128x128xbf16>
    %cst_41 = arith.constant dense<0.000000e+00> : vector<16x128xf32>
    %147 = tpu.matmul %144, %146, %cst_41 {dimension_numbers = #tpu.dot_dimension_numbers<[1], [0], [0], [1], [0, 0, 1, 1], [], []>} : vector<16x128xbf16>, vector<128x128xbf16>, vector<16x128xf32> -> vector<16x128xf32>
    %c0_42 = arith.constant 0 : index
    %c0_43 = arith.constant 0 : index
    %c0_44 = arith.constant 0 : index
    %148 = vector.load %arg12[%c0_42, %c0_43, %c0_44] : memref<1x1x128xf32, #tpu.memory_space<vmem>>, vector<1x1x128xf32>
    %149 = vector.shape_cast %148 : vector<1x1x128xf32> to vector<1x128xf32>
    %150 = vector.broadcast %149 : vector<1x128xf32> to vector<16x128xf32>
    %151 = arith.addf %147, %150 : vector<16x128xf32>
    %152 = vector.shape_cast %151 : vector<16x128xf32> to vector<2x8x128xf32>
    %153 = arith.addf %3, %152 : vector<2x8x128xf32>
    %c0_45 = arith.constant 0 : index
    %c0_46 = arith.constant 0 : index
    %c0_47 = arith.constant 0 : index
    %154 = vector.load %arg13[%c0_45, %c0_46, %c0_47] : memref<1x1x128xf32, #tpu.memory_space<vmem>>, vector<1x1x128xf32>
    %155 = vector.shape_cast %154 : vector<1x1x128xf32> to vector<1x128xf32>
    %c0_48 = arith.constant 0 : index
    %c0_49 = arith.constant 0 : index
    %c0_50 = arith.constant 0 : index
    %156 = vector.load %arg14[%c0_48, %c0_49, %c0_50] : memref<1x1x128xf32, #tpu.memory_space<vmem>>, vector<1x1x128xf32>
    %157 = vector.shape_cast %156 : vector<1x1x128xf32> to vector<1x128xf32>
    %cst_51 = arith.constant dense<0.000000e+00> : vector<2x8xf32>
    %158 = vector.multi_reduction <add>, %153, %cst_51 [2] : vector<2x8x128xf32> to vector<2x8xf32>
    %159 = vector.shape_cast %158 : vector<2x8xf32> to vector<2x8x1xf32>
    %cst_52 = arith.constant 1.280000e+02 : f32
    %160 = vector.broadcast %cst_52 : f32 to vector<2x8x1xf32>
    %161 = arith.divf %159, %160 : vector<2x8x1xf32>
    %162 = vector.broadcast %161 : vector<2x8x1xf32> to vector<2x8x128xf32>
    %163 = arith.subf %153, %162 : vector<2x8x128xf32>
    %164 = arith.mulf %163, %163 : vector<2x8x128xf32>
    %cst_53 = arith.constant dense<0.000000e+00> : vector<2x8xf32>
    %165 = vector.multi_reduction <add>, %164, %cst_53 [2] : vector<2x8x128xf32> to vector<2x8xf32>
    %166 = vector.shape_cast %165 : vector<2x8xf32> to vector<2x8x1xf32>
    %cst_54 = arith.constant 1.280000e+02 : f32
    %167 = vector.broadcast %cst_54 : f32 to vector<2x8x1xf32>
    %168 = arith.divf %166, %167 : vector<2x8x1xf32>
    %169 = vector.broadcast %161 : vector<2x8x1xf32> to vector<2x8x128xf32>
    %170 = arith.subf %153, %169 : vector<2x8x128xf32>
    %cst_55 = arith.constant 9.99999974E-6 : f32
    %171 = vector.broadcast %cst_55 : f32 to vector<2x8x1xf32>
    %172 = arith.addf %168, %171 : vector<2x8x1xf32>
    %173 = math.rsqrt %172 : vector<2x8x1xf32>
    %174 = vector.broadcast %173 : vector<2x8x1xf32> to vector<2x8x128xf32>
    %175 = arith.mulf %170, %174 : vector<2x8x128xf32>
    %176 = vector.shape_cast %155 : vector<1x128xf32> to vector<1x1x128xf32>
    %177 = vector.broadcast %176 : vector<1x1x128xf32> to vector<2x8x128xf32>
    %178 = arith.mulf %175, %177 : vector<2x8x128xf32>
    %179 = vector.shape_cast %157 : vector<1x128xf32> to vector<1x1x128xf32>
    %180 = vector.broadcast %179 : vector<1x1x128xf32> to vector<2x8x128xf32>
    %181 = arith.addf %178, %180 : vector<2x8x128xf32>
    %182 = vector.shape_cast %181 : vector<2x8x128xf32> to vector<16x128xf32>
    %183 = arith.truncf %182 : vector<16x128xf32> to vector<16x128xbf16>
    %c0_56 = arith.constant 0 : index
    %c0_57 = arith.constant 0 : index
    %c0_58 = arith.constant 0 : index
    %184 = vector.load %arg15[%c0_56, %c0_57, %c0_58] : memref<1x128x512xbf16, #tpu.memory_space<vmem>>, vector<1x128x512xbf16>
    %185 = vector.shape_cast %184 : vector<1x128x512xbf16> to vector<128x512xbf16>
    %cst_59 = arith.constant dense<0.000000e+00> : vector<16x512xf32>
    %186 = tpu.matmul %183, %185, %cst_59 {dimension_numbers = #tpu.dot_dimension_numbers<[1], [0], [0], [1], [0, 0, 1, 1], [], []>} : vector<16x128xbf16>, vector<128x512xbf16>, vector<16x512xf32> -> vector<16x512xf32>
    %c0_60 = arith.constant 0 : index
    %c0_61 = arith.constant 0 : index
    %c0_62 = arith.constant 0 : index
    %187 = vector.load %arg16[%c0_60, %c0_61, %c0_62] : memref<1x1x512xf32, #tpu.memory_space<vmem>>, vector<1x1x512xf32>
    %188 = vector.shape_cast %187 : vector<1x1x512xf32> to vector<1x512xf32>
    %189 = vector.broadcast %188 : vector<1x512xf32> to vector<16x512xf32>
    %190 = arith.addf %186, %189 : vector<16x512xf32>
    %cst_63 = arith.constant 1.702000e+00 : f32
    %191 = vector.broadcast %cst_63 : f32 to vector<16x512xf32>
    %192 = arith.mulf %191, %190 : vector<16x512xf32>
    %193 = arith.negf %192 : vector<16x512xf32>
    %194 = math.exp %193 : vector<16x512xf32>
    %cst_64 = arith.constant 1.000000e+00 : f32
    %195 = vector.broadcast %cst_64 : f32 to vector<16x512xf32>
    %196 = arith.addf %195, %194 : vector<16x512xf32>
    %197 = arith.divf %195, %196 : vector<16x512xf32>
    %198 = arith.mulf %190, %197 : vector<16x512xf32>
    %199 = arith.truncf %198 : vector<16x512xf32> to vector<16x512xbf16>
    %c0_65 = arith.constant 0 : index
    %c0_66 = arith.constant 0 : index
    %c0_67 = arith.constant 0 : index
    %200 = vector.load %arg17[%c0_65, %c0_66, %c0_67] : memref<1x512x128xbf16, #tpu.memory_space<vmem>>, vector<1x512x128xbf16>
    %201 = vector.shape_cast %200 : vector<1x512x128xbf16> to vector<512x128xbf16>
    %cst_68 = arith.constant dense<0.000000e+00> : vector<16x128xf32>
    %202 = tpu.matmul %199, %201, %cst_68 {dimension_numbers = #tpu.dot_dimension_numbers<[1], [0], [0], [1], [0, 0, 1, 1], [], []>} : vector<16x512xbf16>, vector<512x128xbf16>, vector<16x128xf32> -> vector<16x128xf32>
    %c0_69 = arith.constant 0 : index
    %c0_70 = arith.constant 0 : index
    %c0_71 = arith.constant 0 : index
    %203 = vector.load %arg18[%c0_69, %c0_70, %c0_71] : memref<1x1x128xf32, #tpu.memory_space<vmem>>, vector<1x1x128xf32>
    %204 = vector.shape_cast %203 : vector<1x1x128xf32> to vector<1x128xf32>
    %205 = vector.broadcast %204 : vector<1x128xf32> to vector<16x128xf32>
    %206 = arith.addf %202, %205 : vector<16x128xf32>
    %207 = vector.shape_cast %206 : vector<16x128xf32> to vector<2x8x128xf32>
    %208 = arith.addf %153, %207 : vector<2x8x128xf32>
    %c0_72 = arith.constant 0 : index
    %c0_73 = arith.constant 0 : index
    %c0_74 = arith.constant 0 : index
    %209 = vector.load %arg24[%c0_72, %c0_73, %c0_74] : memref<2x8x128xf32, #tpu.memory_space<vmem>>, vector<2x8x128xf32>
    tpu.vector_store %arg24[%c0_72, %c0_73, %c0_74], %208 {strides = array<i32>} : memref<2x8x128xf32, #tpu.memory_space<vmem>>, vector<2x8x128xf32>,
    %210 = arith.index_cast %arg1 : i32 to index
    %211 = memref.load %arg3[%210] : memref<3xi32, #tpu.memory_space<smem>>
    %c0_i32_75 = arith.constant 0 : i32
    %212 = arith.cmpi ne, %211, %c0_i32_75 : i32
    %213 = arith.extui %212 : i1 to i32
    %c0_i32_76 = arith.constant 0 : i32
    %214 = arith.cmpi ne, %213, %c0_i32_76 : i32
    scf.if %214 {
      %c0_78 = arith.constant 0 : index
      %c0_79 = arith.constant 0 : index
      %c0_80 = arith.constant 0 : index
      %218 = vector.load %arg24[%c0_78, %c0_79, %c0_80] : memref<2x8x128xf32, #tpu.memory_space<vmem>>, vector<2x8x128xf32>
      %c0_81 = arith.constant 0 : index
      %c0_82 = arith.constant 0 : index
      %c0_83 = arith.constant 0 : index
      %219 = vector.load %arg19[%c0_81, %c0_82, %c0_83] : memref<1x8x128xf32, #tpu.memory_space<vmem>>, vector<1x8x128xf32>
      %220 = vector.shape_cast %219 : vector<1x8x128xf32> to vector<8x128xf32>
      %221 = vector.shape_cast %220 : vector<8x128xf32> to vector<1x8x128xf32>
      %222 = vector.broadcast %221 : vector<1x8x128xf32> to vector<2x8x128xf32>
      %223 = arith.mulf %218, %222 : vector<2x8x128xf32>
      %c0_84 = arith.constant 0 : index
      %c0_85 = arith.constant 0 : index
      %c0_86 = arith.constant 0 : index
      %224 = vector.load %arg24[%c0_84, %c0_85, %c0_86] : memref<2x8x128xf32, #tpu.memory_space<vmem>>, vector<2x8x128xf32>
      tpu.vector_store %arg24[%c0_84, %c0_85, %c0_86], %223 {strides = array<i32>} : memref<2x8x128xf32, #tpu.memory_space<vmem>>, vector<2x8x128xf32>,
    } else {
    }
    %c2_i32 = arith.constant 2 : i32
    %215 = arith.cmpi eq, %arg1, %c2_i32 : i32
    %216 = arith.extui %215 : i1 to i32
    %c0_i32_77 = arith.constant 0 : i32
    %217 = arith.cmpi ne, %216, %c0_i32_77 : i32
    scf.if %217 {
      %c0_78 = arith.constant 0 : index
      %c0_79 = arith.constant 0 : index
      %c0_80 = arith.constant 0 : index
      %218 = vector.load %arg24[%c0_78, %c0_79, %c0_80] : memref<2x8x128xf32, #tpu.memory_space<vmem>>, vector<2x8x128xf32>
      %c2_i32_81 = arith.constant 2 : i32
      %219 = arith.muli %arg0, %c2_i32_81 : i32
      %c0_i32_82 = arith.constant 0 : i32
      %220 = arith.addi %219, %c0_i32_82 : i32
      %221 = arith.index_cast %220 : i32 to index
      %222 = memref.load %arg2[%221] : memref<2xi32, #tpu.memory_space<smem>>
      %223 = tpu.iota {dimensions = array<i32: 0>} : vector<8x1xi32>
      %224 = vector.broadcast %222 : i32 to vector<8x1xi32>
      %225 = arith.cmpi eq, %223, %224 : vector<8x1xi32>
      %226 = vector.extract_strided_slice %218 {offsets = [0, 0, 0], sizes = [1, 8, 128], strides = [1, 1, 1]} : vector<2x8x128xf32> to vector<1x8x128xf32>
      %227 = vector.shape_cast %226 : vector<1x8x128xf32> to vector<8x128xf32>
      %cst_83 = arith.constant 0.000000e+00 : f32
      %228 = vector.shape_cast %225 : vector<8x1xi1> to vector<8x1xi1>
      %229 = vector.broadcast %228 : vector<8x1xi1> to vector<8x128xi1>
      %230 = vector.broadcast %cst_83 : f32 to vector<8x128xf32>
      %231 = arith.select %229, %227, %230 : vector<8x128xi1>, vector<8x128xf32>
      %cst_84 = arith.constant dense<0.000000e+00> : vector<128xf32>
      %232 = vector.multi_reduction <add>, %231, %cst_84 [0] : vector<8x128xf32> to vector<128xf32>
      %233 = vector.shape_cast %232 : vector<128xf32> to vector<1x128xf32>
      %c2_i32_85 = arith.constant 2 : i32
      %234 = arith.muli %arg0, %c2_i32_85 : i32
      %c1_i32 = arith.constant 1 : i32
      %235 = arith.addi %234, %c1_i32 : i32
      %236 = arith.index_cast %235 : i32 to index
      %237 = memref.load %arg2[%236] : memref<2xi32, #tpu.memory_space<smem>>
      %238 = tpu.iota {dimensions = array<i32: 0>} : vector<8x1xi32>
      %239 = vector.broadcast %237 : i32 to vector<8x1xi32>
      %240 = arith.cmpi eq, %238, %239 : vector<8x1xi32>
      %241 = vector.extract_strided_slice %218 {offsets = [1, 0, 0], sizes = [1, 8, 128], strides = [1, 1, 1]} : vector<2x8x128xf32> to vector<1x8x128xf32>
      %242 = vector.shape_cast %241 : vector<1x8x128xf32> to vector<8x128xf32>
      %cst_86 = arith.constant 0.000000e+00 : f32
      %243 = vector.shape_cast %240 : vector<8x1xi1> to vector<8x1xi1>
      %244 = vector.broadcast %243 : vector<8x1xi1> to vector<8x128xi1>
      %245 = vector.broadcast %cst_86 : f32 to vector<8x128xf32>
      %246 = arith.select %244, %242, %245 : vector<8x128xi1>, vector<8x128xf32>
      %cst_87 = arith.constant dense<0.000000e+00> : vector<128xf32>
      %247 = vector.multi_reduction <add>, %246, %cst_87 [0] : vector<8x128xf32> to vector<128xf32>
      %248 = vector.shape_cast %247 : vector<128xf32> to vector<1x128xf32>
      %249 = tpu.concatenate %233, %248 in 0 : vector<1x128xf32>, vector<1x128xf32> -> vector<2x128xf32>
      %c0_88 = arith.constant 0 : index
      %c0_89 = arith.constant 0 : index
      %250 = vector.load %arg20[%c0_88, %c0_89] : memref<1x128xf32, #tpu.memory_space<vmem>>, vector<1x128xf32>
      %c0_90 = arith.constant 0 : index
      %c0_91 = arith.constant 0 : index
      %251 = vector.load %arg21[%c0_90, %c0_91] : memref<1x128xf32, #tpu.memory_space<vmem>>, vector<1x128xf32>
      %cst_92 = arith.constant dense<0.000000e+00> : vector<2xf32>
      %252 = vector.multi_reduction <add>, %249, %cst_92 [1] : vector<2x128xf32> to vector<2xf32>
      %253 = vector.shape_cast %252 : vector<2xf32> to vector<2x1xf32>
      %cst_93 = arith.constant 1.280000e+02 : f32
      %254 = vector.broadcast %cst_93 : f32 to vector<2x1xf32>
      %255 = arith.divf %253, %254 : vector<2x1xf32>
      %256 = vector.broadcast %255 : vector<2x1xf32> to vector<2x128xf32>
      %257 = arith.subf %249, %256 : vector<2x128xf32>
      %258 = arith.mulf %257, %257 : vector<2x128xf32>
      %cst_94 = arith.constant dense<0.000000e+00> : vector<2xf32>
      %259 = vector.multi_reduction <add>, %258, %cst_94 [1] : vector<2x128xf32> to vector<2xf32>
      %260 = vector.shape_cast %259 : vector<2xf32> to vector<2x1xf32>
      %cst_95 = arith.constant 1.280000e+02 : f32
      %261 = vector.broadcast %cst_95 : f32 to vector<2x1xf32>
      %262 = arith.divf %260, %261 : vector<2x1xf32>
      %263 = vector.broadcast %255 : vector<2x1xf32> to vector<2x128xf32>
      %264 = arith.subf %249, %263 : vector<2x128xf32>
      %cst_96 = arith.constant 9.99999974E-6 : f32
      %265 = vector.broadcast %cst_96 : f32 to vector<2x1xf32>
      %266 = arith.addf %262, %265 : vector<2x1xf32>
      %267 = math.rsqrt %266 : vector<2x1xf32>
      %268 = vector.broadcast %267 : vector<2x1xf32> to vector<2x128xf32>
      %269 = arith.mulf %264, %268 : vector<2x128xf32>
      %270 = vector.broadcast %250 : vector<1x128xf32> to vector<2x128xf32>
      %271 = arith.mulf %269, %270 : vector<2x128xf32>
      %272 = vector.broadcast %251 : vector<1x128xf32> to vector<2x128xf32>
      %273 = arith.addf %271, %272 : vector<2x128xf32>
      %274 = arith.truncf %273 : vector<2x128xf32> to vector<2x128xbf16>
      %c0_97 = arith.constant 0 : index
      %c0_98 = arith.constant 0 : index
      %275 = vector.load %arg22[%c0_97, %c0_98] : memref<128x128xbf16, #tpu.memory_space<vmem>>, vector<128x128xbf16>
      %cst_99 = arith.constant dense<0.000000e+00> : vector<2x128xf32>
      %276 = tpu.matmul %274, %275, %cst_99 {dimension_numbers = #tpu.dot_dimension_numbers<[1], [0], [0], [1], [0, 0, 1, 1], [], []>} : vector<2x128xbf16>, vector<128x128xbf16>, vector<2x128xf32> -> vector<2x128xf32>
      %c0_100 = arith.constant 0 : index
      %c0_101 = arith.constant 0 : index
      %277 = vector.load %arg23[%c0_100, %c0_101] : memref<2x128xf32, #tpu.memory_space<vmem>>, vector<2x128xf32>
      tpu.vector_store %arg23[%c0_100, %c0_101], %276 {strides = array<i32>} : memref<2x128xf32, #tpu.memory_space<vmem>>, vector<2x128xf32>,
    } else {
    }
    return
  }
  func.func @transform_0(%arg0: i32, %arg1: i32, %arg2: memref<2xi32, #tpu.memory_space<smem>>, %arg3: memref<3xi32, #tpu.memory_space<smem>>, %arg4: memref<3xi32, #tpu.memory_space<smem>>) -> (i32, i32, i32) {
    %c0_i32 = arith.constant 0 : i32
    %c0_i32_0 = arith.constant 0 : i32
    %c0_i32_1 = arith.constant 0 : i32
    return %arg0, %c0_i32, %c0_i32_0 : i32, i32, i32
  }
  func.func @transform_1(%arg0: i32, %arg1: i32, %arg2: memref<2xi32, #tpu.memory_space<smem>>, %arg3: memref<3xi32, #tpu.memory_space<smem>>, %arg4: memref<3xi32, #tpu.memory_space<smem>>) -> (i32, i32) {
    %c0_i32 = arith.constant 0 : i32
    %c0_i32_0 = arith.constant 0 : i32
    %c0_i32_1 = arith.constant 0 : i32
    return %c0_i32, %c0_i32_0 : i32, i32
  }
  func.func @transform_2(%arg0: i32, %arg1: i32, %arg2: memref<2xi32, #tpu.memory_space<smem>>, %arg3: memref<3xi32, #tpu.memory_space<smem>>, %arg4: memref<3xi32, #tpu.memory_space<smem>>) -> (i32, i32, i32) {
    %c0_i32 = arith.constant 0 : i32
    %c0_i32_0 = arith.constant 0 : i32
    %c0_i32_1 = arith.constant 0 : i32
    return %arg1, %c0_i32, %c0_i32_0 : i32, i32, i32
  }
  func.func @transform_3(%arg0: i32, %arg1: i32, %arg2: memref<2xi32, #tpu.memory_space<smem>>, %arg3: memref<3xi32, #tpu.memory_space<smem>>, %arg4: memref<3xi32, #tpu.memory_space<smem>>) -> (i32, i32, i32) {
    %c0_i32 = arith.constant 0 : i32
    %c0_i32_0 = arith.constant 0 : i32
    %c0_i32_1 = arith.constant 0 : i32
    return %arg1, %c0_i32, %c0_i32_0 : i32, i32, i32
  }
  func.func @transform_4(%arg0: i32, %arg1: i32, %arg2: memref<2xi32, #tpu.memory_space<smem>>, %arg3: memref<3xi32, #tpu.memory_space<smem>>, %arg4: memref<3xi32, #tpu.memory_space<smem>>) -> (i32, i32, i32) {
    %c0_i32 = arith.constant 0 : i32
    %c0_i32_0 = arith.constant 0 : i32
    %c0_i32_1 = arith.constant 0 : i32
    return %arg1, %c0_i32, %c0_i32_0 : i32, i32, i32
  }
  func.func @transform_5(%arg0: i32, %arg1: i32, %arg2: memref<2xi32, #tpu.memory_space<smem>>, %arg3: memref<3xi32, #tpu.memory_space<smem>>, %arg4: memref<3xi32, #tpu.memory_space<smem>>) -> (i32, i32, i32) {
    %c0_i32 = arith.constant 0 : i32
    %c0_i32_0 = arith.constant 0 : i32
    %c0_i32_1 = arith.constant 0 : i32
    return %arg1, %c0_i32, %c0_i32_0 : i32, i32, i32
  }
  func.func @transform_6(%arg0: i32, %arg1: i32, %arg2: memref<2xi32, #tpu.memory_space<smem>>, %arg3: memref<3xi32, #tpu.memory_space<smem>>, %arg4: memref<3xi32, #tpu.memory_space<smem>>) -> (i32, i32, i32) {
    %c0_i32 = arith.constant 0 : i32
    %c0_i32_0 = arith.constant 0 : i32
    %c0_i32_1 = arith.constant 0 : i32
    return %arg1, %c0_i32, %c0_i32_0 : i32, i32, i32
  }
  func.func @transform_7(%arg0: i32, %arg1: i32, %arg2: memref<2xi32, #tpu.memory_space<smem>>, %arg3: memref<3xi32, #tpu.memory_space<smem>>, %arg4: memref<3xi32, #tpu.memory_space<smem>>) -> (i32, i32, i32) {
    %c0_i32 = arith.constant 0 : i32
    %c0_i32_0 = arith.constant 0 : i32
    %c0_i32_1 = arith.constant 0 : i32
    return %arg1, %c0_i32, %c0_i32_0 : i32, i32, i32
  }
  func.func @transform_8(%arg0: i32, %arg1: i32, %arg2: memref<2xi32, #tpu.memory_space<smem>>, %arg3: memref<3xi32, #tpu.memory_space<smem>>, %arg4: memref<3xi32, #tpu.memory_space<smem>>) -> (i32, i32, i32) {
    %c0_i32 = arith.constant 0 : i32
    %c0_i32_0 = arith.constant 0 : i32
    %c0_i32_1 = arith.constant 0 : i32
    return %arg1, %c0_i32, %c0_i32_0 : i32, i32, i32
  }
  func.func @transform_9(%arg0: i32, %arg1: i32, %arg2: memref<2xi32, #tpu.memory_space<smem>>, %arg3: memref<3xi32, #tpu.memory_space<smem>>, %arg4: memref<3xi32, #tpu.memory_space<smem>>) -> (i32, i32, i32) {
    %c0_i32 = arith.constant 0 : i32
    %c0_i32_0 = arith.constant 0 : i32
    %c0_i32_1 = arith.constant 0 : i32
    return %arg1, %c0_i32, %c0_i32_0 : i32, i32, i32
  }
  func.func @transform_10(%arg0: i32, %arg1: i32, %arg2: memref<2xi32, #tpu.memory_space<smem>>, %arg3: memref<3xi32, #tpu.memory_space<smem>>, %arg4: memref<3xi32, #tpu.memory_space<smem>>) -> (i32, i32, i32) {
    %c0_i32 = arith.constant 0 : i32
    %c0_i32_0 = arith.constant 0 : i32
    %c0_i32_1 = arith.constant 0 : i32
    return %arg1, %c0_i32, %c0_i32_0 : i32, i32, i32
  }
  func.func @transform_11(%arg0: i32, %arg1: i32, %arg2: memref<2xi32, #tpu.memory_space<smem>>, %arg3: memref<3xi32, #tpu.memory_space<smem>>, %arg4: memref<3xi32, #tpu.memory_space<smem>>) -> (i32, i32, i32) {
    %c0_i32 = arith.constant 0 : i32
    %c0_i32_0 = arith.constant 0 : i32
    %c0_i32_1 = arith.constant 0 : i32
    return %arg1, %c0_i32, %c0_i32_0 : i32, i32, i32
  }
  func.func @transform_12(%arg0: i32, %arg1: i32, %arg2: memref<2xi32, #tpu.memory_space<smem>>, %arg3: memref<3xi32, #tpu.memory_space<smem>>, %arg4: memref<3xi32, #tpu.memory_space<smem>>) -> (i32, i32, i32) {
    %c0_i32 = arith.constant 0 : i32
    %c0_i32_0 = arith.constant 0 : i32
    %c0_i32_1 = arith.constant 0 : i32
    return %arg1, %c0_i32, %c0_i32_0 : i32, i32, i32
  }
  func.func @transform_13(%arg0: i32, %arg1: i32, %arg2: memref<2xi32, #tpu.memory_space<smem>>, %arg3: memref<3xi32, #tpu.memory_space<smem>>, %arg4: memref<3xi32, #tpu.memory_space<smem>>) -> (i32, i32, i32) {
    %c0_i32 = arith.constant 0 : i32
    %c0_i32_0 = arith.constant 0 : i32
    %c0_i32_1 = arith.constant 0 : i32
    return %arg1, %c0_i32, %c0_i32_0 : i32, i32, i32
  }
  func.func @transform_14(%arg0: i32, %arg1: i32, %arg2: memref<2xi32, #tpu.memory_space<smem>>, %arg3: memref<3xi32, #tpu.memory_space<smem>>, %arg4: memref<3xi32, #tpu.memory_space<smem>>) -> (i32, i32, i32) {
    %0 = arith.index_cast %arg1 : i32 to index
    %1 = memref.load %arg4[%0] : memref<3xi32, #tpu.memory_space<smem>>
    %c0_i32 = arith.constant 0 : i32
    %c0_i32_0 = arith.constant 0 : i32
    %c0_i32_1 = arith.constant 0 : i32
    return %1, %c0_i32, %c0_i32_0 : i32, i32, i32
  }
  func.func @transform_15(%arg0: i32, %arg1: i32, %arg2: memref<2xi32, #tpu.memory_space<smem>>, %arg3: memref<3xi32, #tpu.memory_space<smem>>, %arg4: memref<3xi32, #tpu.memory_space<smem>>) -> (i32, i32) {
    %c0_i32 = arith.constant 0 : i32
    %c0_i32_0 = arith.constant 0 : i32
    %c0_i32_1 = arith.constant 0 : i32
    return %c0_i32, %c0_i32_0 : i32, i32
  }
  func.func @transform_16(%arg0: i32, %arg1: i32, %arg2: memref<2xi32, #tpu.memory_space<smem>>, %arg3: memref<3xi32, #tpu.memory_space<smem>>, %arg4: memref<3xi32, #tpu.memory_space<smem>>) -> (i32, i32) {
    %c0_i32 = arith.constant 0 : i32
    %c0_i32_0 = arith.constant 0 : i32
    %c0_i32_1 = arith.constant 0 : i32
    return %c0_i32, %c0_i32_0 : i32, i32
  }
  func.func @transform_17(%arg0: i32, %arg1: i32, %arg2: memref<2xi32, #tpu.memory_space<smem>>, %arg3: memref<3xi32, #tpu.memory_space<smem>>, %arg4: memref<3xi32, #tpu.memory_space<smem>>) -> (i32, i32) {
    %c0_i32 = arith.constant 0 : i32
    %c0_i32_0 = arith.constant 0 : i32
    %c0_i32_1 = arith.constant 0 : i32
    return %c0_i32, %c0_i32_0 : i32, i32
  }
  func.func @transform_18(%arg0: i32, %arg1: i32, %arg2: memref<2xi32, #tpu.memory_space<smem>>, %arg3: memref<3xi32, #tpu.memory_space<smem>>, %arg4: memref<3xi32, #tpu.memory_space<smem>>) -> (i32, i32) {
    %c0_i32 = arith.constant 0 : i32
    %c0_i32_0 = arith.constant 0 : i32
    return %arg0, %c0_i32 : i32, i32
  }
}

</mosaic_0001>

<bundles_post_ra>
// kernel: tpu_custom_call.1
= control target key start
LH: loop header
LB: loop body
LE: loop exit
PB: predicated region body
PF: predicated region fallthrough
CT: control target
= control target key end

     0   :  { %s4590_s29 = smov [#allocation4]   ;;  %s4592_s22 = smov [#allocation6]   ;;  %s5515_s0 = inlined_call_operand.hbm [shape: s32[2], index: 0, kind: input, shape index: {}]   ;;  %s5516_s3 = inlined_call_operand.hbm [shape: f32[2,8,128], index: 3, kind: input, shape index: {}]   ;;  %s5517_s4 = inlined_call_operand.hbm [shape: f32[8,8], index: 4, kind: input, shape index: {}]   ;;  %s5518_s5 = inlined_call_operand.hbm [shape: f32[3,1,128], index: 5, kind: input, shape index: {}]   ;;  %s5519_s6 = inlined_call_operand.hbm [shape: f32[3,1,128], index: 6, kind: input, shape index: {}]   ;;  %s5520_s7 = inlined_call_operand.hbm [shape: bf16[3,128,384], index: 7, kind: input, shape index: {}]   ;;  %s5521_s8 = inlined_call_operand.hbm [shape: f32[3,1,384], index: 8, kind: input, shape index: {}]   ;;  %s5522_s9 = inlined_call_operand.hbm [shape: bf16[3,128,128], index: 9, kind: input, shape index: {}]   ;;  %s5523_s10 = inlined_call_operand.hbm [shape: f32[3,1,128], index: 10, kind: input, shape index: {}]   ;;  %s5524_s11 = inlined_call_operand.hbm [shape: f32[3,1,128], index: 11, kind: input, shape index: {}]   ;;  %s5525_s12 = inlined_call_operand.hbm [shape: f32[3,1,128], index: 12, kind: input, shape index: {}]   ;;  %s5526_s13 = inlined_call_operand.hbm [shape: bf16[3,128,512], index: 13, kind: input, shape index: {}]   ;;  %s5527_s14 = inlined_call_operand.hbm [shape: f32[3,1,512], index: 14, kind: input, shape index: {}]   ;;  %s5528_s15 = inlined_call_operand.hbm [shape: bf16[3,512,128], index: 15, kind: input, shape index: {}]   ;;  %s5529_s16 = inlined_call_operand.hbm [shape: f32[3,1,128], index: 16, kind: input, shape index: {}]   ;;  %s5530_s17 = inlined_call_operand.vmem [shape: f32[2,8,128], index: 17, kind: input, shape index: {}]   ;;  %s5531_s18 = inlined_call_operand.vmem [shape: f32[1,128], index: 18, kind: input, shape index: {}]   ;;  %s5532_s19 = inlined_call_operand.vmem [shape: f32[1,128], index: 19, kind: input, shape index: {}]   ;;  %s5533_s20 = inlined_call_operand.hbm [shape: bf16[128,128], index: 20, kind: input, shape index: {}]   ;;  %s5534_s21 = inlined_call_operand.hbm [shape: f32[2,128], index: 21, kind: output, shape index: {}]   ;;  %s5535_s1 = inlined_call_operand.hbm [shape: s32[3], index: 1, kind: input, shape index: {}]   ;;  %s5536_s2 = inlined_call_operand.hbm [shape: s32[3], index: 2, kind: input, shape index: {}]  }
   0x1   :  { %5546 = sst [smem:[#allocation38_spill]] %s5515_s0  ;;  %s32_s28 = sshll.u32 %s5535_s1, 4  ;;  %s33_s28 = int_to_ptr.hbm [resolvable:$true] %s32_s28 }
   0x2   :  { %5547 = sst [smem:[#allocation39_spill]] %s5516_s3  ;;  %s4591_s0 = smov [#allocation5]  }
   0x3   :  { %5548 = sst [smem:[#allocation40_spill]] %s5517_s4 }
   0x4   :  { %5549 = sst [smem:[#allocation41_spill]] %s5518_s5 }
   0x5   :  { %5550 = sst [smem:[#allocation42_spill]] %s5519_s6 }
   0x6   :  { %5551 = sst [smem:[#allocation43_spill]] %s5520_s7  ;;  %s37_s7 = sshll.u32 %s5536_s2, 4  ;;  %s38_s7 = int_to_ptr.hbm [resolvable:$true] %s37_s7 }
   0x7   :  { %5552 = sst [smem:[#allocation44_spill]] %s5521_s8 }
   0x8   :  { %5553 = sst [smem:[#allocation45_spill]] %s5530_s17 }
   0x9   :  { %5554 = sst [smem:[#allocation46_spill]] %s5531_s18 }
   0xa   :  { %5555 = sst [smem:[#allocation47_spill]] %s5532_s19 }
   0xb   :  { %5556 = sst [smem:[#allocation48_spill]] %s5533_s20 }
   0xc   :  { %5557 = sst [smem:[#allocation49_spill]] %s5534_s21 }
   0xd   :  { %s5558_s26 = sld [smem:[#allocation38_spill]] }
  0x13   :  { %s27_s17 = sshll.u32 %s5558_s26, 4  ;;  %s28_s17 = int_to_ptr.hbm [resolvable:$true] %s27_s17 }
  0x14   :  { %30 = dma.hbm_to_smem %s28_s17, 16, %s4590_s29, [#allocation3] }
  0x15   :  { %35 = dma.hbm_to_smem %s33_s28, 16, %s4591_s0, [#allocation3] }
  0x16   :  { %40 = dma.hbm_to_smem %s38_s7, 16, %s4592_s22, [#allocation3] }
  0x17   :  { %4544 = dma.done.wait [#allocation3], 48 }
  0x18   :  { %4545 = vsyncadd [#allocation3], 4294967248 }
  0x19   :  { %43 = sfence }
  0x1a   :  { %44 = vsyncpa [#allocation8], 0 }
  0x1b   :  { %45 = vsyncpa [#allocation11], 0 }
  0x1c   :  { %46 = vsyncpa [#allocation9], 0  ;;  %s4730_s1 = smov 0   ;;  %s4732_s23 = smov 0  }
  0x1d   :  { %s4734_s17 = smov 0   ;;  %s4736_s3 = smov 0  }
  0x1e   :  { %s4738_s24 = smov 0   ;;  %s4740_s2 = smov 0  }
  0x1f LB: > { %5559 = sst [smem:[#allocation32_spill]] %s4572_s23  ;;  %s4759_s4 = sadd.s32 4294967295, %s4588_s2   ;;  %s4588_s2 = sphi %s4740_s2, %s52_s2   ;;  %s4584_s24 = sphi %s4738_s24, %s5612_s24   ;;  %s4580_s3 = sphi %s4736_s3, %s5611_s3   ;;  %s4576_s17 = sphi %s4734_s17, %s5610_s17   ;;  %s4572_s23 = sphi %s4732_s23, %s5609_s23   ;;  %s4568_s1 = sphi %s4730_s1, %s5606_s1  }
  0x20   : > { %5560 = sst [smem:[#allocation33_spill]] %s4580_s3  ;;  %s61_s25 = sadd.s32 1, %s4584_s24 }
  0x21   : > { %5561 = sst [smem:[#allocation34_spill]] %s4759_s4  ;;  %p62_p0 = scmp.ge.s32.totalorder %s61_s25, 3 }
  0x22   : > { %s118_s26 = sadd.s32 1, %s4576_s17  ;;  %p125_p1 = scmp.ne.s32.totalorder %s4576_s17, %s4572_s23 }
  0x23   : > { %p126_p2 = scmp.eq.s32.totalorder %s4588_s2, 0  ;;  %s5614_s25 = smov (%p62_p0, %s61_s25), 0 }
  0x24   : > { %5562 = sst [smem:[#allocation35_spill]] %s5614_s25  ;;  %p131_p4 = scmp.ne.s32.totalorder %s4572_s23, %s4568_s1 }
  0x25   : > { %p4768_p3 = por %p126_p2, %p125_p1  ;;  %s115_s5 = ssub.s32 %s4584_s24, %s5614_s25 }
  0x26   : > { %p132_p5 = scmp.eq.s32.totalorder %s4759_s4, 0  ;;  %p116_p6 = scmp.eq.s32.totalorder %s115_s5, 0 }
  0x27   : > { %p3217_p7 = scmp.ge.s32.totalorder %s4588_s2, 1  ;;  %p545_p9 = scmp.lt.s32.totalorder %s4588_s2, 4 }
  0x28   : > { %p4779_p8 = por %p132_p5, %p131_p4  ;;  %s5568_s7 = sld [smem:[#allocation40_spill]] }
  0x29   : > { %s4785_s29 = scalar_select %p116_p6, %s4576_s17, %s118_s26  }
  0x2a   : > { %s5564_s28 = scalar_select %p4779_p8, 1, 0 }
  0x2b   : > { %5566 = sst [smem:[#allocation37_spill]] %s4785_s29  ;;  %p4787_p10 = pnand %p3217_p7, %p545_p9 }
  0x2c   : > { %5565 = sst [smem:[#allocation36_spill]] %s5564_s28  ;;  %s4593_s1 = smov [#allocation10]  }
  0x2d   : > { %p3844_p11 = pneg %p4787_p10  ;;  %s576_s5 = sshll.u32 %s4593_s1, 4  ;;  %s577_s5 = int_to_ptr.vmem [resolvable:$true] %s576_s5 }
  0x2e   : > { %s574_s22 = sshll.u32 %s5568_s7, 4  ;;  %s5570_s21 = sld [smem:[#allocation39_spill]]  ;;  %s575_s22 = int_to_ptr.hbm [resolvable:$true] %s574_s22 }
  0x2f   : > { %p4798_p12 = pnand %p3844_p11, %p132_p5  ;;  %s4594_s6 = smov [#allocation7]  }
  0x30   : > { %s561_s30 = sshll.u32 %s4594_s6, 4  ;;  %s5571_s20 = sld [smem:[#allocation48_spill]]  ;;  %s562_s30 = int_to_ptr.vmem [resolvable:$true] %s561_s30 }
  0x31   : > { %3850 = dma.hbm_to_vmem [thread:$0]  (!%p4798_p12), %s575_s22, 128, %s577_s5, [#allocation11]  }
  0x32   : > { %s4595_s3 = smov 128   ;;  %s4596_s28 = smov 8  }
  0x33   : > { %s4597_s23 = smov [#allocation24]   ;;  %s4599_s29 = smov 4  }
  0x34   : > { %s559_s19 = sshll.u32 %s5570_s21, 4  ;;  %s593_s4 = sshll.u32 %s4597_s23, 4  ;;  %s560_s19 = int_to_ptr.hbm [resolvable:$true] %s559_s19  ;;  %s594_s4 = int_to_ptr.vmem [resolvable:$true] %s593_s4 }
  0x35   : > { %3847 = dma.hbm_to_vmem [thread:$0]  (!%p4798_p12), %s560_s19, 256, %s562_s30, [#allocation8], %s4595_s3, %s4595_s3, %s4596_s28  }
  0x36   : > { %s591_s18 = sshll.u32 %s5571_s20, 4  ;;  %s4598_s21 = smov 64   ;;  %s592_s18 = int_to_ptr.hbm [resolvable:$true] %s591_s18 }
  0x37   : > { %3853 = dma.hbm_to_vmem [thread:$0]  (!%p4798_p12), %s592_s18, 1024, %s594_s4, [#allocation11], %s4598_s21, %s4598_s21, %s4599_s29  }
  0x38   : > { %p3221_p13 = scmp.ge.s32.totalorder %s4588_s2, 3 }
  0x39   : > { %s607_s22 = sand.u32 (!%p3221_p13), 1, %s4588_s2   ;;  %s4817_s5 = sand.u32 (!%p3221_p13), 1, %s4576_s17  }
  0x3a   : > { %603 = sbr.rel (%p3221_p13) target bundleno = 106 (0x6a), region = 36  ;;  %s5572_s28 = sld [smem:[#allocation41_spill]] (!%p3221_p13) }
  0x3b   : > { %s610_s18 = scalar_lea.vmem (!%p3221_p13), [#allocation12], %s4817_s5  ;;  %s4824_s26 = scalar_lea.sflag (!%p3221_p13), [#allocation8], %s607_s22 }
  0x3c   : > { %s617_s4 = sshll.u32 (!%p3221_p13), %s610_s18, 4  ;;  %s5573_s7 = sld [smem:[#allocation42_spill]] (!%p3221_p13)  ;;  %s618_s4 = int_to_ptr.vmem [resolvable:$true] %s617_s4 }
  0x3d   : > { %s627_s21 = scalar_lea.vmem (!%p3221_p13), [#allocation13], %s4817_s5  ;;  %s3798_s3 = smul.u32 (!%p3221_p13), 192, %s4817_s5 }
  0x3e   : > { %s634_s29 = sshll.u32 (!%p3221_p13), %s627_s21, 4  ;;  %s3799_s22 = smul.u32 (!%p3221_p13), 192, %s4584_s24  ;;  %s635_s29 = int_to_ptr.vmem [resolvable:$true] %s634_s29 }
  0x3f   : > { %s4601_s21 = smov 12   ;;  %s3801_s20 = smul.u32 3, %s4584_s24 }
  0x40   : > { %s613_s23 = scalar_lea.hbm %s5572_s28, %s4584_s24  ;;  %s645_s28 = scalar_lea.vmem [#allocation14], %s3798_s3 }
  0x41   : > { %s615_s25 = sshll.u32 %s613_s23, 4  ;;  %s653_s23 = sshll.u32 %s645_s28, 4  ;;  %s616_s25 = int_to_ptr.hbm [resolvable:$true] %s615_s25  ;;  %s654_s23 = int_to_ptr.vmem [resolvable:$true] %s653_s23 }
  0x42   : > { %3810 = dma.hbm_to_vmem [thread:$0]  (%p4768_p3), %s616_s25, 16, %s618_s4, %s4824_s26  }
  0x43   : > { %s630_s1 = scalar_lea.hbm %s5573_s7, %s4584_s24  ;;  %s5574_s25 = sld [smem:[#allocation43_spill]] }
  0x44   : > { %s632_s19 = sshll.u32 %s630_s1, 4  ;;  %s3800_s7 = smul.u32 3, %s4817_s5  ;;  %s633_s19 = int_to_ptr.hbm [resolvable:$true] %s632_s19 }
  0x45   : > { %3811 = dma.hbm_to_vmem [thread:$0]  (%p4768_p3), %s633_s19, 16, %s635_s29, %s4824_s26  }
  0x46   : > { %s4600_s1 = smov 192   ;;  %s667_s29 = scalar_lea.vmem [#allocation15], %s3800_s7 }
  0x47   : > { %s675_s19 = sshll.u32 %s667_s29, 4  ;;  %s3223_s3 = sshll.u32 %s4817_s5, 6  ;;  %s676_s19 = int_to_ptr.vmem [resolvable:$true] %s675_s19 }
  0x48   : > { %s5575_s8 = sld [smem:[#allocation44_spill]]  ;;  %s686_s7 = scalar_lea.vmem [#allocation16], %s3223_s3 }
  0x49   : > { %s650_s6 = scalar_lea.hbm %s5574_s25, %s3799_s22  ;;  %s3691_s25 = sshll.u32 %s4584_s24, 6 }
  0x4a   : > { %s651_s30 = sshll.u32 %s650_s6, 4  ;;  %s5545_s29 = smov 4   ;;  %s652_s30 = int_to_ptr.hbm [resolvable:$true] %s651_s30 }
  0x4b   : > { %3812 = dma.hbm_to_vmem [thread:$0]  (%p4768_p3), %s652_s30, 3072, %s654_s23, %s4824_s26, %s4600_s1, %s4600_s1, %s4601_s21  }
  0x4c   : > { %s691_s30 = scalar_lea.hbm %s5522_s9, %s3691_s25  ;;  %s694_s1 = sshll.u32 %s686_s7, 4  ;;  %s695_s1 = int_to_ptr.vmem [resolvable:$true] %s694_s1 }
  0x4d   : > { %s692_s21 = sshll.u32 %s691_s30, 4  ;;  %s710_s3 = scalar_lea.hbm %s5523_s10, %s4584_s24  ;;  %s693_s21 = int_to_ptr.hbm [resolvable:$true] %s692_s21 }
  0x4e   : > { %s671_s22 = scalar_lea.hbm %s5575_s8, %s3801_s20  ;;  %s5544_s20 = smov 64  }
  0x4f   : > { %s673_s4 = sshll.u32 %s671_s22, 4  ;;  %s707_s18 = scalar_lea.vmem [#allocation17], %s4817_s5  ;;  %s674_s4 = int_to_ptr.hbm [resolvable:$true] %s673_s4 }
  0x50   : > { %3813 = dma.hbm_to_vmem [thread:$0]  (%p4768_p3), %s674_s4, 48, %s676_s19, %s4824_s26  }
  0x51   : > { %3814 = dma.hbm_to_vmem [thread:$0]  (%p4768_p3), %s693_s21, 1024, %s695_s1, %s4824_s26, %s5544_s20, %s5544_s20, %s5545_s29  }
  0x52   : > { %s714_s22 = sshll.u32 %s707_s18, 4  ;;  %s712_s4 = sshll.u32 %s710_s3, 4  ;;  %s715_s22 = int_to_ptr.vmem [resolvable:$true] %s714_s22  ;;  %s713_s4 = int_to_ptr.hbm [resolvable:$true] %s712_s4 }
  0x53   : > { %3815 = dma.hbm_to_vmem [thread:$0]  (%p4768_p3), %s713_s4, 16, %s715_s22, %s4824_s26  }
  0x54   : > { %s727_s23 = scalar_lea.hbm %s5524_s11, %s4584_s24  ;;  %s724_s30 = scalar_lea.vmem [#allocation18], %s4817_s5 }
  0x55   : > { %s731_s7 = sshll.u32 %s724_s30, 4  ;;  %s729_s1 = sshll.u32 %s727_s23, 4  ;;  %s732_s7 = int_to_ptr.vmem [resolvable:$true] %s731_s7  ;;  %s730_s1 = int_to_ptr.hbm [resolvable:$true] %s729_s1 }
  0x56   : > { %3816 = dma.hbm_to_vmem [thread:$0]  (%p4768_p3), %s730_s1, 16, %s732_s7, %s4824_s26  }
  0x57   : > { %s744_s28 = scalar_lea.hbm %s5525_s12, %s4584_s24  ;;  %s741_s3 = scalar_lea.vmem [#allocation19], %s4817_s5 }
  0x58   : > { %s748_s18 = sshll.u32 %s741_s3, 4  ;;  %s746_s22 = sshll.u32 %s744_s28, 4  ;;  %s749_s18 = int_to_ptr.vmem [resolvable:$true] %s748_s18  ;;  %s747_s22 = int_to_ptr.hbm [resolvable:$true] %s746_s22 }
  0x59   : > { %s3226_s4 = sshll.u32 %s4817_s5, 8  ;;  %s3692_s25 = sshll.u32 %s4584_s24, 8 }
  0x5a   : > { %3817 = dma.hbm_to_vmem [thread:$0]  (%p4768_p3), %s747_s22, 16, %s749_s18, %s4824_s26  }
  0x5b   : > { %s764_s30 = scalar_lea.hbm %s5526_s13, %s3692_s25  ;;  %s759_s7 = scalar_lea.vmem [#allocation20], %s3226_s4 }
  0x5c   : > { %s767_s1 = sshll.u32 %s759_s7, 4  ;;  %s765_s21 = sshll.u32 %s764_s30, 4  ;;  %s768_s1 = int_to_ptr.vmem [resolvable:$true] %s767_s1  ;;  %s766_s21 = int_to_ptr.hbm [resolvable:$true] %s765_s21 }
  0x5d   : > { %s3229_s19 = sshll.u32 %s4817_s5, 2  ;;  %s4604_s28 = smov 256  }
  0x5e   : > { %s4605_s3 = smov 16   ;;  %s3230_s18 = sshll.u32 %s4584_s24, 2 }
  0x5f   : > { %3818 = dma.hbm_to_vmem [thread:$0]  (%p4768_p3), %s766_s21, 4096, %s768_s1, %s4824_s26, %s4604_s28, %s4604_s28, %s4605_s3  }
  0x60   : > { %s785_s6 = scalar_lea.hbm %s5527_s14, %s3230_s18  ;;  %s781_s23 = scalar_lea.vmem [#allocation21], %s3229_s19 }
  0x61   : > { %s789_s29 = sshll.u32 %s781_s23, 4  ;;  %s787_s7 = sshll.u32 %s785_s6, 4  ;;  %s790_s29 = int_to_ptr.vmem [resolvable:$true] %s789_s29  ;;  %s788_s7 = int_to_ptr.hbm [resolvable:$true] %s787_s7 }
  0x62   : > { %3819 = dma.hbm_to_vmem [thread:$0]  (%p4768_p3), %s788_s7, 64, %s790_s29, %s4824_s26  }
  0x63   : > { %s805_s1 = scalar_lea.hbm %s5528_s15, %s3692_s25  ;;  %s800_s21 = scalar_lea.vmem [#allocation22], %s3226_s4 }
  0x64   : > { %s808_s28 = sshll.u32 %s800_s21, 4  ;;  %s806_s3 = sshll.u32 %s805_s1, 4  ;;  %s809_s28 = int_to_ptr.vmem [resolvable:$true] %s808_s28  ;;  %s807_s3 = int_to_ptr.hbm [resolvable:$true] %s806_s3 }
  0x65   : > { %s5576_s20 = smov 4   ;;  %s5577_s19 = smov 64  }
  0x66   : > { %3820 = dma.hbm_to_vmem [thread:$0]  (%p4768_p3), %s807_s3, 4096, %s809_s28, %s4824_s26, %s5577_s19, %s5577_s19, %s5576_s20  }
  0x67   : > { %s824_s6 = scalar_lea.hbm %s5529_s16, %s4584_s24  ;;  %s821_s23 = scalar_lea.vmem [#allocation23], %s4817_s5 }
  0x68   : > { %s828_s29 = sshll.u32 %s821_s23, 4  ;;  %s826_s7 = sshll.u32 %s824_s6, 4  ;;  %s829_s29 = int_to_ptr.vmem [resolvable:$true] %s828_s29  ;;  %s827_s7 = int_to_ptr.hbm [resolvable:$true] %s826_s7 }
  0x69   : > { %3821 = dma.hbm_to_vmem [thread:$0]  (%p4768_p3), %s827_s7, 16, %s829_s29, %s4824_s26  }
  0x6a PF: > { %846 = sbr.rel (%p4787_p10) target bundleno = 2567 (0xa07), region = 92  ;;  %s5578_s8 = sld [smem:[#allocation34_spill]] (!%p4787_p10) }
  0x6f   : > { %4547 = dma.done.wait (%p132_p5), [#allocation8], 256  }
  0x70   : > { %4549 = vsyncadd (%p132_p5), [#allocation8], 4294967040 }
  0x71   : > { %4551 = dma.done.wait (%p132_p5), [#allocation11], 128  }
  0x72   : > { %4553 = vsyncadd (%p132_p5), [#allocation11], 4294967168  ;;  %s5579_s5 = sld [smem:[#allocation32_spill]]  ;;  %s858_s26 = sand.u32 1, %s5578_s8  }
  0x73   : > { %s859_s0 = scalar_lea.sflag [#allocation8], %s858_s26 }
  0x78   : > { %s4933_s4 = sand.u32 1, %s5579_s5  }
  0x79   : > { %s861_s25 = scalar_lea.vmem [#allocation12], %s4933_s4 }
  0x7a   : > { %4555 = dma.done.wait (%p4779_p8), %s859_s0, 12496  }
  0x7b   : > { %4557 = vsyncadd (%p4779_p8), %s859_s0, 4294954800  ;;  %s3802_s30 = smul.u32 192, %s4933_s4  ;;  %s3237_s21 = sshll.u32 %s4933_s4, 6 }
  0x7c   : > { %s3803_s1 = smul.u32 3, %s4933_s4  ;;  %s3238_s28 = sshll.u32 %s4933_s4, 8 }
  0x7d   : > { %s3239_s3 = sshll.u32 %s4933_s4, 2  ;;  %s870_s20 = scalar_lea.vmem [#allocation13], %s4933_s4 }
  0x7e   : > { %s4946_s19 = scalar_lea.vmem [#allocation14], %s3802_s30  ;;  %s4948_s18 = scalar_lea.vmem [#allocation15], %s3803_s1 }
  0x7f   : > { %s4950_s22 = scalar_lea.vmem [#allocation16], %s3237_s21  ;;  %s4955_s7 = scalar_lea.vmem [#allocation20], %s3238_s28 }
  0x80   : > { %s4957_s5 = scalar_lea.vmem [#allocation21], %s3239_s3  ;;  %s4959_s27 = scalar_lea.vmem [#allocation22], %s3238_s28 }
  0x81   : > { %s966_s26 = scalar_lea.vmem [#allocation23], %s4933_s4 }
  0x82   : > { %4559 = dma.done.wait (%p132_p5), [#allocation11], 1024  }
  0x83   : > { %4561 = vsyncadd (%p132_p5), [#allocation11], 4294966272  ;;  %s5581_s0 = sld [smem:[#allocation33_spill]] }
  0x84   : > { %s5582_s29 = sld [smem:[#allocation45_spill]] }
  0x89   : > { %s1075_s30 = sld [smem:[#allocation6 + %s5581_s0]]  ;;  %p3243_p1 = scmp.ne.s32.totalorder %s5581_s0, 0 }
  0x8f   : > { %p1076_p0 = scmp.lt.s32.totalorder %s1075_s30, 1  ;;  %1085 = sbr.rel (%p3243_p1) target bundleno = 151 (0x97), region = 156 }
  0x91   : > { %s5616_s30 = smov (!%p1076_p0, %s1075_s30), 1 }
  0x92   : > { %s3242_s1 = sshll.u32 %s5616_s30, 3 }
  0x93   : > { %s4970_s6 = scalar_lea.vmem %s5582_s29, %s3242_s1 }
  0x94   : > { %v1086_v0 = vld [vmem:[#allocation7] sm:$0xff]  ;;  %v1087_v1 = vld [vmem:[#allocation7 + $0x8] sm:$0xff] }
  0x95   : > { %1088 = vst [vmem:[#allocation2] sm:$0xff] %v1086_v0 }
  0x96   : > { %1089 = vst [vmem:[#allocation2 + $0x8] sm:$0xff] %v1087_v1 }
  0x97 PF: > { %v4606_v4 = vmov 128.0   ;;  %v3330_v19 = vld [vmem:[%s4946_s19 + $0xa8] sm:$0xf]  ;;  %v3716_v20 = vld [vmem:[%s4946_s19 + $0xb0] sm:$0xf0]  ;;  %vm1367_vm7 = vcmask 261120  }
  0x98   : > { %3952 = vrcp.f32 %v4606_v4  ;;  %v3715_v21 = vld [vmem:[%s4946_s19 + $0xac] sm:$0xf]  ;;  %v3331_v22 = vor.u32 %v3716_v20, %v3330_v19  ;;  %v3332_v23 = vld [vmem:[%s4946_s19 + $0xb4] sm:$0xf0]  ;;  %v3338_v24 = vld [vmem:[%s4946_s19 + $0xb0] sm:$0xf] }
  0x99   : > { %v3717_v25 = vld [vmem:[%s4946_s19 + $0xb8] sm:$0xf0]  ;;  %v3335_v26 = vor.u32 %v3715_v21, %v3332_v23  ;;  %v3318_v28 = vld [vmem:[%s4946_s19 + $0x90] sm:$0xf]  ;;  %v3712_v30 = vld [vmem:[%s4946_s19 + $0x94] sm:$0xf] }
  0x9a   : > { %v3339_v27 = vor.u32 %v3717_v25, %v3338_v24  ;;  %1320 = vmatpush.bf16.msra.mxu0 %v3331_v22  ;;  %v3713_v29 = vld [vmem:[%s4946_s19 + $0x98] sm:$0xf0]  ;;  %v3320_v32 = vld [vmem:[%s4946_s19 + $0x9c] sm:$0xf0]  ;;  %v3326_v33 = vld [vmem:[%s4946_s19 + $0x98] sm:$0xf] }
  0x9b   : > { %1334 = vmatpush.bf16.msra.mxu1 %v3335_v26  ;;  %v3319_v31 = vor.u32 %v3713_v29, %v3318_v28  ;;  %v3714_v34 = vld [vmem:[%s4946_s19 + $0xa0] sm:$0xf0]  ;;  %v3323_v35 = vor.u32 %v3712_v30, %v3320_v32  ;;  %v3306_v37 = vld [vmem:[%s4946_s19 + $0x78] sm:$0xf]  ;;  %v3709_v39 = vld [vmem:[%s4946_s19 + $0x7c] sm:$0xf] }
  0x9c   : > { %v4973_v2 = vld [vmem:[#allocation2] sm:$0xff]  ;;  %1348 = vmatpush.bf16.msra.mxu2 %v3339_v27  ;;  %v3327_v36 = vor.u32 %v3714_v34, %v3326_v33  ;;  %v3710_v38 = vld [vmem:[%s4946_s19 + $0x80] sm:$0xf0]  ;;  %v3308_v41 = vld [vmem:[%s4946_s19 + $0x84] sm:$0xf0]  ;;  %s4607_s8 = smov 96  }
  0x9d   : > { %1094 = vadd.xlane.f32.xlu0 %v4973_v2  ;;  %v4976_v3 = vld [vmem:[#allocation2 + $0x8] sm:$0xff]  ;;  %v3307_v40 = vor.u32 %v3710_v38, %v3306_v37  ;;  %v3711_v43 = vld [vmem:[%s4946_s19 + $0x88] sm:$0xf0]  ;;  %v3311_v44 = vor.u32 %v3709_v39, %v3308_v41  ;;  %v3706_v48 = vld [vmem:[%s4946_s19 + $0x64] sm:$0xf]  ;;  %vm1436_vm8 = vcmask 1043456  }
  0x9e   : > { %v3953_v5 = vpop.eup %3952  ;;  %1321 = vmatpush.bf16.msra.mxu0 %v3319_v31  ;;  %v3314_v42 = vld [vmem:[%s4946_s19 + $0x80] sm:$0xf]  ;;  %v3707_v47 = vld [vmem:[%s4946_s19 + $0x68] sm:$0xf0]  ;;  %v3296_v50 = vld [vmem:[%s4946_s19 + $0x6c] sm:$0xf0] }
  0x9f   : > { %v1099_v6 = vmul.f32 128.0, %v3953_v5  ;;  %vm1103_vm0 = vweird.f32 %v3953_v5  ;;  %1335 = vmatpush.bf16.msra.mxu1 %v3323_v35  ;;  %v3315_v45 = vor.u32 %v3711_v43, %v3314_v42  ;;  %v3294_v46 = vld [vmem:[%s4946_s19 + $0x60] sm:$0xf]  ;;  %v3302_v51 = vld [vmem:[%s4946_s19 + $0x68] sm:$0xf]  ;;  %v3299_v53 = vor.u32 %v3706_v48, %v3296_v50  ;;  %s4609_s28 = smov 32  }
  0xa0   : > { %1349 = vmatpush.bf16.msra.mxu2 %v3327_v36  ;;  %v3295_v49 = vor.u32 %v3707_v47, %v3294_v46  ;;  %v3708_v52 = vld [vmem:[%s4946_s19 + $0x70] sm:$0xf0]  ;;  %v3282_v55 = vld [vmem:[%s4946_s19 + $0x48] sm:$0xf]  ;;  %v3703_v57 = vld [vmem:[%s4946_s19 + $0x4c] sm:$0xf] }
  0xa1   : > { %v1100_v7 = vsub.f32 1.0, %v1099_v6  ;;  %v3303_v54 = vor.u32 %v3708_v52, %v3302_v51  ;;  %v3704_v56 = vld [vmem:[%s4946_s19 + $0x50] sm:$0xf0]  ;;  %v3284_v59 = vld [vmem:[%s4946_s19 + $0x54] sm:$0xf0]  ;;  %vm1406_vm9 = vcmask 64512  }
  0xa2   : > { %1322 = vmatpush.bf16.msra.mxu0 %v3307_v40  ;;  %v3283_v58 = vor.u32 %v3704_v56, %v3282_v55  ;;  %v3290_v60 = vld [vmem:[%s4946_s19 + $0x50] sm:$0xf]  ;;  %v3705_v61 = vld [vmem:[%s4946_s19 + $0x58] sm:$0xf0]  ;;  %v3287_v62 = vor.u32 %v3703_v57, %v3284_v59  ;;  %v3700_v4 = vld [vmem:[%s4946_s19 + $0x34] sm:$0xf] }
  0xa3   : > { %v1101_v8 = vmul.f32 %v3953_v5, %v1100_v7  ;;  %1336 = vmatpush.bf16.msra.mxu1 %v3311_v44  ;;  %v3291_v63 = vor.u32 %v3705_v61, %v3290_v60  ;;  %v3270_v0 = vld [vmem:[%s4946_s19 + $0x30] sm:$0xf]  ;;  %v3701_v1 = vld [vmem:[%s4946_s19 + $0x38] sm:$0xf0]  ;;  %v3272_v6 = vld [vmem:[%s4946_s19 + $0x3c] sm:$0xf0] }
  0xa4   : > { %1350 = vmatpush.bf16.msra.mxu2 %v3315_v45  ;;  %v3278_v7 = vld [vmem:[%s4946_s19 + $0x38] sm:$0xf]  ;;  %v3266_v19 = vld [vmem:[%s4946_s19 + $0x20] sm:$0xf]  ;;  %v3699_v20 = vld [vmem:[%s4946_s19 + $0x28] sm:$0xf0] }
  0xa5   : > { %1096 = vadd.xlane.f32.xlu0 %v4976_v3  ;;  %v1102_v9 = vadd.f32 %v3953_v5, %v1101_v8  ;;  %v3702_v8 = vld [vmem:[%s4946_s19 + $0x40] sm:$0xf0]  ;;  %v3267_v22 = vor.u32 %v3699_v20, %v3266_v19  ;;  %v3246_v23 = vld [vmem:[%s4946_s19] sm:$0xf]  ;;  %v3695_v24 = vld [vmem:[%s4946_s19 + $0x8] sm:$0xf0] }
  0xa6   : > { %1323 = vmatpush.bf16.msra.mxu0 %v3295_v49  ;;  %v3694_v25 = vld [vmem:[%s4946_s19 + $0x4] sm:$0xf]  ;;  %v3247_v27 = vor.u32 %v3695_v24, %v3246_v23  ;;  %v3248_v28 = vld [vmem:[%s4946_s19 + $0xc] sm:$0xf0]  ;;  %v3254_v29 = vld [vmem:[%s4946_s19 + $0x8] sm:$0xf] }
  0xa7   : > { %v4979_v10 = vsel %vm1103_vm0, %v3953_v5, %v1102_v9  ;;  %1337 = vmatpush.bf16.msra.mxu1 %v3299_v53  ;;  %v3271_v5 = vor.u32 %v3701_v1, %v3270_v0  ;;  %v3275_v9 = vor.u32 %v3700_v4, %v3272_v6  ;;  %v3696_v30 = vld [vmem:[%s4946_s19 + $0x10] sm:$0xf0]  ;;  %v3251_v32 = vor.u32 %v3694_v25, %v3248_v28  ;;  %v3946_v51 = vld [vmem:[%s861_s25] ss:$0 sm:$0xff]  ;;  %s4608_s25 = smov 64   ;;  %s5583_s3 = scalar_lea.vmem [#allocation17], %s4933_s4 }
  0xa8   : > { %1351 = vmatpush.bf16.msra.mxu2 %v3303_v54  ;;  %v3255_v33 = vor.u32 %v3696_v30, %v3254_v29  ;;  %v3947_v56 = vld [vmem:[%s870_s20] ss:$0 sm:$0xff]  ;;  %vm1852_vm10 = vcmask 523264   ;;  %vm1855_vm11 = vcmask 785408   ;;  %s5584_s20 = scalar_lea.vmem [#allocation18], %s4933_s4 }
  0xaa   : > { %1324 = vmatpush.bf16.msra.mxu0 %v3283_v58 }
  0xab   : > { %1338 = vmatpush.bf16.msra.mxu1 %v3287_v62 }
  0xac   : > { %1352 = vmatpush.bf16.msra.mxu2 %v3291_v63 }
  0xae   : > { %1325 = vmatpush.bf16.msra.mxu0 %v3271_v5 }
  0xaf   : > { %1339 = vmatpush.bf16.msra.mxu1 %v3275_v9 }
 0x110   : > { %v1095_v11 = vpop.xlane.xlu0 %1094 }
 0x111   : > { %v1105_v12 = vmul.f32 %v4979_v10, %v1095_v11  ;;  %v3279_v11 = vor.u32 %v3702_v8, %v3278_v7 }
 0x113   : > { %v4983_v13 = vsub.f32 %v4973_v2, %v1105_v12  ;;  %1353 = vmatpush.bf16.msra.mxu2 %v3279_v11  ;;  %v3258_v12 = vld [vmem:[%s4946_s19 + $0x18] sm:$0xf] }
 0x115   : > { %v1109_v14 = vmul.f32 %v4983_v13, %v4983_v13 }
 0x117   : > { %1111 = vadd.xlane.f32.xlu1 %v1109_v14  ;;  %v3698_v14 = vld [vmem:[%s4946_s19 + $0x20] sm:$0xf0]  ;;  %1354 = vmatpush.bf16.msra.mxu2 %v3267_v22 }
 0x118   : > { %v1097_v15 = vpop.xlane.xlu0 %1096 }
 0x119   : > { %v1106_v16 = vmul.f32 %v4979_v10, %v1097_v15  ;;  %v3697_v15 = vld [vmem:[%s4946_s19 + $0x1c] sm:$0xf] }
 0x11b   : > { %v4989_v17 = vsub.f32 %v4976_v3, %v1106_v16  ;;  %v3259_v16 = vor.u32 %v3698_v14, %v3258_v12  ;;  %1355 = vmatpush.bf16.msra.mxu2 %v3255_v33 }
 0x11d   : > { %v1110_v18 = vmul.f32 %v4989_v17, %v4989_v17  ;;  %1326 = vmatpush.bf16.msra.mxu0 %v3259_v16 }
 0x11f   : > { %1113 = vadd.xlane.f32.xlu1 %v1110_v18  ;;  %v3260_v18 = vld [vmem:[%s4946_s19 + $0x24] sm:$0xf0]  ;;  %s5585_s19 = scalar_lea.vmem [#allocation19], %s4933_s4 }
 0x120   : > { %v3263_v21 = vor.u32 %v3697_v15, %v3260_v18 }
 0x121   : > { %1327 = vmatpush.bf16.msra.mxu0 %v3247_v27 }
 0x122   : > { %1340 = vmatpush.bf16.msra.mxu1 %v3263_v21 }
 0x126   : > { %1341 = vmatpush.bf16.msra.mxu1 %v3251_v32 }
 0x18a   : > { %v1112_v26 = vpop.xlane.xlu1 %1111 }
 0x18b   : > { %v1115_v31 = vmul.f32 %v1112_v26, %v4979_v10 }
 0x18d   : > { %v1117_v34 = vadd.f32 1e-05, %v1115_v31 }
 0x18f   : > { %3954 = vrsqrt.f32 %v1117_v34  ;;  %vm1125_vm2 = vweird.f32 %v1117_v34 }
 0x192   : > { %v1114_v35 = vpop.xlane.xlu1 %1113 }
 0x193   : > { %v1116_v36 = vmul.f32 %v1114_v35, %v4979_v10 }
 0x195   : > { %v3955_v37 = vpop.eup %3954  ;;  %v1118_v38 = vadd.f32 1e-05, %v1116_v36 }
 0x196   : > { %v1120_v39 = vmul.f32 %v3955_v37, %v1117_v34  ;;  %vm1126_vm1 = vweird.f32 %v3955_v37 }
 0x197   : > { %3956 = vrsqrt.f32 %v1118_v38  ;;  %vm1127_vm3 = vmor %vm1125_vm2, %vm1126_vm1  ;;  %vm1135_vm5 = vweird.f32 %v1118_v38 }
 0x198   : > { %v1121_v40 = vmul.f32 %v3955_v37, %v1120_v39 }
 0x19a   : > { %v1122_v41 = vmul.f32 0.5, %v1121_v40 }
 0x19c   : > { %v1123_v42 = vsub.f32 1.5, %v1122_v41 }
 0x19d   : > { %v3957_v43 = vpop.eup %3956 }
 0x19e   : > { %v1124_v44 = vmul.f32 %v3955_v37, %v1123_v42  ;;  %v1130_v45 = vmul.f32 %v3957_v43, %v1118_v38  ;;  %vm1136_vm4 = vweird.f32 %v3957_v43 }
 0x19f   : > { %vm1137_vm6 = vmor %vm1135_vm5, %vm1136_vm4 }
 0x1a0   : > { %v1131_v46 = vmul.f32 %v3957_v43, %v1130_v45  ;;  %v1128_v47 = vsel %vm1127_vm3, %v3955_v37, %v1124_v44 }
 0x1a1   : > { %v1139_v50 = vmul.f32 %v1128_v47, %v4983_v13  ;;  %v1184_v13 = vld [vmem:[%s4948_s18] sm:$0x7]  ;;  %s5600_s18 = sld [smem:[#allocation33_spill]] }
 0x1a2   : > { %v1132_v48 = vmul.f32 0.5, %v1131_v46  ;;  %v1187_v61 = vperm.slane %v1184_v13, 1  ;;  %v1186_v62 = vperm.slane %v1184_v13, 0 }
 0x1a3   : > { %v1144_v55 = vmul.f32 %v3946_v51, %v1139_v50  ;;  %v5083_v50 = vld [vmem:[#allocation10] sm:$0xff] }
 0x1a4   : > { %v1133_v49 = vsub.f32 1.5, %v1132_v48 }
 0x1a5   : > { %v1149_v58 = vadd.f32 %v3947_v56, %v1144_v55 }
 0x1a6   : > { %v1134_v52 = vmul.f32 %v3957_v43, %v1133_v49 }
 0x1a8   : > { %v1138_v53 = vsel %vm1137_vm6, %v3957_v43, %v1134_v52 }
 0x1a9   : > { %v1140_v54 = vmul.f32 %v1138_v53, %v4989_v17  ;;  %v1188_v17 = vperm.slane %v1184_v13, 2 }
 0x1ab   : > { %v1145_v57 = vmul.f32 %v3946_v51, %v1140_v54 }
 0x1ad   : > { %v1150_v59 = vadd.f32 %v3947_v56, %v1145_v57 }
 0x1af   : > { %v1151_v60 = vpack.c.bf16 %v1150_v59, %v1149_v58 }
 0x1b1   : > { %1328 = vmatmul.bf16.vlgmr.msra.gmra.mxu0 %v1151_v60  ;;  %1342 = vmatmul.bf16.vlgmr.msra.gmra.mxu1 %v1151_v60 }
 0x1b2   : > { %1356 = vmatmul.bf16.vlgmr.msra.gmra.mxu2 %v1151_v60 }
 0x22e   : > { %v1329_v63 = vpop.f32.mrf.mxu0  ;;  %v1343_v0 = vpop.f32.mrf.mxu1 }
 0x22f   : > { %v1344_v1 = vadd.f32 %v1343_v0, %v1187_v61  ;;  %v1330_v5 = vadd.f32 %v1329_v63, %v1186_v62 }
 0x231   : > { %v1365_v4 = vpack.c.bf16 %v1344_v1, %v1344_v1  ;;  %v1363_v11 = vpack.c.bf16 %v1330_v5, %v1330_v5 }
 0x233   : > { %v1478_v6 = vunpack.c.l.b16 %v1365_v4  ;;  %v1372_v7 = vsel %vm1367_vm7, %v1365_v4, 0  ;;  %v1473_v22 = vunpack.c.l.b16 %v1363_v11 }
 0x234   : > { %1381 = vmatpush.bf16.xpose.msra.mxu3 %v1372_v7 }
 0x235   : > { %v1479_v8 = vpack.c.b16 %v1478_v6, %v1478_v6  ;;  %v1357_v9 = vpop.f32.mrf.mxu2  ;;  %v1474_v30 = vpack.c.b16 %v1473_v22, %v1473_v22 }
 0x236   : > { %v1358_v12 = vadd.f32 %v1357_v9, %v1188_v17  ;;  %v1331_v14 = vpop.f32.mrf.mxu0  ;;  %v1345_v15 = vpop.f32.mrf.mxu1 }
 0x237   : > { %v1332_v16 = vadd.f32 %v1331_v14, %v1186_v62  ;;  %v1346_v18 = vadd.f32 %v1345_v15, %v1187_v61  ;;  %1480 = vrot.lane.b32.xlu2 %v1479_v8, %s4607_s8 }
 0x238   : > { %v5052_v19 = vpack.c.bf16 %v1358_v12, %v1358_v12 }
 0x239   : > { %v1364_v20 = vpack.c.bf16 %v1332_v16, %v1332_v16  ;;  %v1366_v21 = vpack.c.bf16 %v1346_v18, %v1346_v18 }
 0x23a   : > { %v1438_v26 = vsel %vm1436_vm8, %v5052_v19, 0  ;;  %v1555_v5 = vunpack.c.l.b16 %v5052_v19 }
 0x23b   : > { %v1502_v23 = vunpack.c.l.b16 %v1364_v20  ;;  %v1507_v24 = vunpack.c.l.b16 %v1366_v21  ;;  %3340 = vmatmul.msk.bf16.vlgmr.msra.gmra.mxu3 %vm1367_vm7, %v1363_v11  ;;  %v1391_v25 = vsel %vm1367_vm7, %v1366_v21, 0 }
 0x23c   : > { %1400 = vmatpush.bf16.xpose.msrb.mxu3 %v1391_v25  ;;  %v5097_v7 = vpack.c.b16 %v1555_v5, %v1555_v5 }
 0x23d   : > { %v1503_v27 = vpack.c.b16 %v1502_v23, %v1502_v23  ;;  %v1508_v28 = vpack.c.b16 %v1507_v24, %v1507_v24  ;;  %v1359_v29 = vpop.f32.mrf.mxu2 }
 0x23e   : > { %v1360_v31 = vadd.f32 %v1359_v29, %v1188_v17 }
 0x23f   : > { %1509 = vrot.lane.b32.xlu0 %v1508_v28, %s4607_s8  ;;  %1504 = vrot.lane.b32.xlu1 %v1503_v27, %s4607_s8 }
 0x240   : > { %v5060_v32 = vpack.c.bf16 %v1360_v31, %v1360_v31  ;;  %1475 = vrot.lane.b32.xlu2 %v1474_v30, %s4607_s8 }
 0x242   : > { %v1457_v33 = vsel %vm1436_vm8, %v5060_v32, 0 }
 0x243   : > { %1466 = vmatpush.bf16.msrb.mxu0 %v1457_v33 }
 0x244   : > { %1447 = vmatpush.bf16.msra.mxu3 %v1438_v26 }
 0x247   : > { %1625 = vrot.lane.b32.xlu0 %v1503_v27, %s4608_s25  ;;  %1739 = vrot.lane.b32.xlu1 %v1508_v28, %s4609_s28 }
 0x248   : > { %1604 = vrot.lane.b32.xlu2 %v1479_v8, %s4608_s25 }
 0x24b   : > { %3341 = vmatmul.msk.bf16.vlgmr.msrb.gmra.mxu3 %vm1367_vm7, %v1364_v20 }
 0x24f   : > { %1714 = vrot.lane.b32.xlu0 %v1474_v30, %s4609_s28 }
 0x250   : > { %1627 = vrot.lane.b32.xlu2 %v1508_v28, %s4608_s25  ;;  %v1579_v28 = vunpack.c.l.b16 %v5060_v32 }
 0x258   : > { %1602 = vrot.lane.b32.xlu2 %v1474_v30, %s4608_s25  ;;  %v5108_v30 = vpack.c.b16 %v1579_v28, %v1579_v28 }
 0x260   : > { %1716 = vrot.lane.b32.xlu2 %v1479_v8, %s4609_s28 }
 0x268   : > { %1737 = vrot.lane.b32.xlu2 %v1503_v27, %s4609_s28 }
 0x291   : > { %v1481_v34 = vpop.permute.xlu2 %1480 }
 0x292   : > { %v1486_v35 = vsel %vm1367_vm7, %v1481_v34, 0 }
 0x293   : > { %1495 = vmatpush.bf16.xpose.msrb.mxu2 %v1486_v35 }
 0x29a   : > { %v1476_v36 = vpop.permute.xlu2 %1475 }
 0x29b   : > { %3344 = vmatmul.msk.bf16.vlgmr.msrb.gmra.mxu2 %vm1367_vm7, %v1476_v36 }
 0x2a2   : > { %v1605_v37 = vpop.permute.xlu2 %1604 }
 0x2a3   : > { %v1610_v38 = vsel %vm1367_vm7, %v1605_v37, 0 }
 0x2a4   : > { %1619 = vmatpush.bf16.xpose.msrb.mxu1 %v1610_v38 }
 0x2aa   : > { %v1628_v39 = vpop.permute.xlu2 %1627 }
 0x2ab   : > { %v1633_v44 = vsel %vm1367_vm7, %v1628_v39, 0 }
 0x2b1   : > { %v1510_v40 = vpop.permute.xlu0 %1509  ;;  %v1505_v41 = vpop.permute.xlu1 %1504 }
 0x2b2   : > { %v1515_v42 = vsel %vm1367_vm7, %v1510_v40, 0  ;;  %v1603_v43 = vpop.permute.xlu2 %1602 }
 0x2b3   : > { %3348 = vmatmul.msk.bf16.vlgmr.msrb.gmra.mxu1 %vm1367_vm7, %v1603_v43  ;;  %1524 = vmatpush.bf16.xpose.msra.mxu2 %v1515_v42 }
 0x2b9   : > { %v1626_v45 = vpop.permute.xlu0 %1625  ;;  %v1740_v46 = vpop.permute.xlu1 %1739 }
 0x2ba   : > { %v1745_v47 = vsel %vm1367_vm7, %v1740_v46, 0  ;;  %v1717_v48 = vpop.permute.xlu2 %1716  ;;  %3345 = vmatmul.msk.bf16.vlgmr.msra.gmra.mxu2 %vm1367_vm7, %v1505_v41 }
 0x2bb   : > { %1642 = vmatpush.bf16.xpose.msrb.mxu2 %v1633_v44  ;;  %v1722_v49 = vsel %vm1367_vm7, %v1717_v48, 0 }
 0x2bc   : > { %1731 = vmatpush.bf16.xpose.msra.mxu1 %v1722_v49 }
 0x2be   : > { %v1383_v51 = vpop.f32.mrf.mxu3 }
 0x2bf   : > { %v1384_v52 = vadd.f32 %v1383_v51, %v5083_v50 }
 0x2c1   : > { %v1715_v53 = vpop.permute.xlu0 %1714  ;;  %v1407_v54 = vsel %vm1406_vm9, %v1384_v52, -inf }
 0x2c2   : > { %1408 = vmax.xlane.f32.xlu1 %v1407_v54  ;;  %v1738_v60 = vpop.permute.xlu2 %1737 }
 0x2c3   : > { %1754 = vmatpush.bf16.xpose.msra.mxu2 %v1745_v47  ;;  %3352 = vmatmul.msk.bf16.vlgmr.msra.gmra.mxu1 %vm1367_vm7, %v1715_v53 }
 0x2c6   : > { %v1385_v55 = vpop.f32.mrf.mxu3 }
 0x2ca   : > { %3349 = vmatmul.msk.bf16.vlgmr.msrb.gmra.mxu2 %vm1367_vm7, %v1626_v45 }
 0x2ce   : > { %v1402_v56 = vpop.f32.mrf.mxu3 }
 0x2cf   : > { %v1403_v57 = vadd.f32 %v1402_v56, %v5083_v50 }
 0x2d1   : > { %v1410_v58 = vsel %vm1406_vm9, %v1403_v57, -inf }
 0x2d2   : > { %1411 = vmax.xlane.f32.xlu0 %v1410_v58 }
 0x2d6   : > { %v1404_v59 = vpop.f32.mrf.mxu3 }
 0x2da   : > { %3353 = vmatmul.msk.bf16.vlgmr.msra.gmra.mxu2 %vm1367_vm7, %v1738_v60 }
 0x31e   : > { %v1497_v13 = vpop.f32.mrf.mxu2 }
 0x31f   : > { %v1498_v61 = vadd.f32 %v1497_v13, %v5083_v50 }
 0x321   : > { %v1530_v62 = vsel %vm1406_vm9, %v1498_v61, -inf }
 0x322   : > { %1531 = vmax.xlane.f32.xlu2 %v1530_v62 }
 0x326   : > { %v1499_v63 = vpop.f32.mrf.mxu2 }
 0x330   : > { %v1621_v0 = vpop.f32.mrf.mxu1 }
 0x331   : > { %v1622_v1 = vadd.f32 %v1621_v0, %v5083_v50 }
 0x333   : > { %v1648_v4 = vsel %vm1406_vm9, %v1622_v1, -inf }
 0x334   : > { %1649 = vmax.xlane.f32.xlu0 %v1648_v4 }
 0x335   : > { %v1409_v17 = vpop.xlane.xlu1 %1408 }
 0x336   : > { %v1413_v6 = vsub.f32 %v1384_v52, %v1409_v17 }
 0x338   : > { %v1415_v8 = vmul.f32 1.442695, %v1413_v6  ;;  %v1623_v9 = vpop.f32.mrf.mxu1 }
 0x33a   : > { %3958 = vpow2.f32 %v1415_v8  ;;  %1672 = vrot.lane.b32.xlu2 %v5097_v7, %s4608_s25 }
 0x33d   : > { %v1526_v11 = vpop.f32.mrf.mxu2 }
 0x33e   : > { %v1527_v12 = vadd.f32 %v1526_v11, %v5083_v50 }
 0x340   : > { %v3959_v14 = vpop.eup %3958  ;;  %v1733_v15 = vpop.f32.mrf.mxu1  ;;  %v1533_v16 = vsel %vm1406_vm9, %v1527_v12, -inf }
 0x341   : > { %1534 = vmax.xlane.f32.xlu1 %v1533_v16  ;;  %v1419_v18 = vsel %vm1406_vm9, %v3959_v14, 0.0  ;;  %v1734_v19 = vadd.f32 %v1733_v15, %v5083_v50 }
 0x342   : > { %1420 = vadd.xlane.f32.xlu0 %v1419_v18 }
 0x343   : > { %v1760_v25 = vsel %vm1406_vm9, %v1734_v19, -inf }
 0x345   : > { %v1528_v20 = vpop.f32.mrf.mxu2  ;;  %v1412_v21 = vpop.xlane.xlu0 %1411 }
 0x346   : > { %v1414_v22 = vsub.f32 %v1403_v57, %v1412_v21 }
 0x348   : > { %v1417_v23 = vmul.f32 1.442695, %v1414_v22  ;;  %v1735_v24 = vpop.f32.mrf.mxu1 }
 0x349   : > { %1761 = vmax.xlane.f32.xlu1 %v1760_v25 }
 0x34a   : > { %3960 = vpow2.f32 %v1417_v23 }
 0x34d   : > { %v1644_v26 = vpop.f32.mrf.mxu2 }
 0x34e   : > { %v1645_v34 = vadd.f32 %v1644_v26, %v5083_v50 }
 0x350   : > { %v3961_v27 = vpop.eup %3960  ;;  %v1651_v35 = vsel %vm1406_vm9, %v1645_v34, -inf }
 0x351   : > { %v1422_v29 = vsel %vm1406_vm9, %v3961_v27, 0.0 }
 0x352   : > { %1423 = vadd.xlane.f32.xlu1 %v1422_v29 }
 0x355   : > { %v1646_v31 = vpop.f32.mrf.mxu2 }
 0x356   : > { %1581 = vrot.lane.b32.xlu0 %v5108_v30, %s4607_s8 }
 0x35d   : > { %v1756_v33 = vpop.f32.mrf.mxu2 }
 0x35e   : > { %v1757_v37 = vadd.f32 %v1756_v33, %v5083_v50 }
 0x360   : > { %v1763_v32 = vsel %vm1406_vm9, %v1757_v37, -inf }
 0x363   : > { %1652 = vmax.xlane.f32.xlu2 %v1651_v35 }
 0x365   : > { %v1758_v36 = vpop.f32.mrf.mxu2 }
 0x36b   : > { %1764 = vmax.xlane.f32.xlu2 %v1763_v32  ;;  %1557 = vrot.lane.b32.xlu1 %v5097_v7, %s4607_s8 }
 0x395   : > { %v1532_v38 = vpop.xlane.xlu2 %1531 }
 0x396   : > { %v1536_v39 = vsub.f32 %v1498_v61, %v1532_v38 }
 0x398   : > { %v1538_v40 = vmul.f32 1.442695, %v1536_v39 }
 0x39a   : > { %3962 = vpow2.f32 %v1538_v40 }
 0x39d   : > { %v1673_v4 = vpop.permute.xlu2 %1672 }
 0x3a0   : > { %v5118_v41 = vpop.eup %3962 }
 0x3a1   : > { %v1542_v42 = vsel %vm1406_vm9, %v5118_v41, 0.0 }
 0x3a2   : > { %1543 = vadd.xlane.f32.xlu0 %v1542_v42 }
 0x3a7   : > { %v1650_v43 = vpop.xlane.xlu0 %1649 }
 0x3a8   : > { %v1654_v44 = vsub.f32 %v1622_v1, %v1650_v43 }
 0x3aa   : > { %v1656_v45 = vmul.f32 1.442695, %v1654_v44 }
 0x3ac   : > { %3964 = vpow2.f32 %v1656_v45 }
 0x3b2   : > { %v5122_v46 = vpop.eup %3964 }
 0x3b3   : > { %v1660_v47 = vsel %vm1406_vm9, %v5122_v46, 0.0 }
 0x3b4   : > { %1661 = vadd.xlane.f32.xlu2 %v1660_v47  ;;  %v1535_v48 = vpop.xlane.xlu1 %1534 }
 0x3b5   : > { %v1537_v49 = vsub.f32 %v1527_v12, %v1535_v48  ;;  %v1421_v50 = vpop.xlane.xlu0 %1420 }
 0x3b6   : > { %1693 = vrot.lane.b32.xlu0 %v5108_v30, %s4608_s25  ;;  %3966 = vrcp.f32 %v1421_v50 }
 0x3b7   : > { %v1540_v51 = vmul.f32 1.442695, %v1537_v49 }
 0x3b9   : > { %3968 = vpow2.f32 %v1540_v51 }
 0x3bc   : > { %v3967_v52 = vpop.eup %3966  ;;  %v1762_v53 = vpop.xlane.xlu1 %1761 }
 0x3bd   : > { %v1427_v54 = vmul.f32 %v3967_v52, %v3959_v14  ;;  %v1766_v55 = vsub.f32 %v1734_v19, %v1762_v53  ;;  %v1678_v14 = vsel %vm1436_vm8, %v1673_v4, 0 }
 0x3bf   : > { %v3969_v56 = vpop.eup %3968  ;;  %v1429_v57 = vpack.c.bf16 %v1427_v54, %v1427_v54  ;;  %v1768_v58 = vmul.f32 1.442695, %v1766_v55 }
 0x3c0   : > { %v1545_v59 = vsel %vm1406_vm9, %v3969_v56, 0.0 }
 0x3c1   : > { %3970 = vpow2.f32 %v1768_v58  ;;  %3342 = vmatmul.msk.bf16.vlgmr.msra.gmra.mxu3 %vm1406_vm9, %v1429_v57  ;;  %1546 = vadd.xlane.f32.xlu2 %v1545_v59 }
 0x3c5   : > { %v1424_v60 = vpop.xlane.xlu1 %1423 }
 0x3c6   : > { %3972 = vrcp.f32 %v1424_v60 }
 0x3c7   : > { %v5130_v13 = vpop.eup %3970 }
 0x3c8   : > { %v1582_v61 = vpop.permute.xlu0 %1581  ;;  %v1772_v62 = vsel %vm1406_vm9, %v5130_v13, 0.0 }
 0x3c9   : > { %v1587_v63 = vsel %vm1436_vm8, %v1582_v61, 0  ;;  %1773 = vadd.xlane.f32.xlu1 %v1772_v62 }
 0x3ca   : > { %1596 = vmatpush.bf16.msra.mxu0 %v1587_v63 }
 0x3cc   : > { %v3973_v0 = vpop.eup %3972 }
 0x3cd   : > { %v1428_v1 = vmul.f32 %v3973_v0, %v3961_v27 }
 0x3cf   : > { %v1430_v5 = vpack.c.bf16 %v1428_v1, %v1428_v1 }
 0x3d1   : > { %3343 = vmatmul.msk.bf16.vlgmr.msrb.gmra.mxu0 %vm1406_vm9, %v1430_v5 }
 0x3d6   : > { %v1653_v17 = vpop.xlane.xlu2 %1652 }
 0x3d7   : > { %v1655_v6 = vsub.f32 %v1645_v34, %v1653_v17 }
 0x3d9   : > { %v1658_v8 = vmul.f32 1.442695, %v1655_v6  ;;  %v3725_v6 = vld [vmem:[%s4950_s22 + $0x38] sm:$0xff] }
 0x3da   : > { %1927 = vmatpush.bf16.msrb.mxu1 %v3725_v6  ;;  %v3470_v6 = vld [vmem:[%s4955_s7 + $0xa0] sm:$0xf] }
 0x3db   : > { %3974 = vpow2.f32 %v1658_v8  ;;  %v3724_v8 = vld [vmem:[%s4950_s22 + $0x30] sm:$0xff] }
 0x3dd   : > { %v1558_v9 = vpop.permute.xlu1 %1557 }
 0x3de   : > { %v1765_v11 = vpop.xlane.xlu2 %1764  ;;  %v1563_v12 = vsel %vm1436_vm8, %v1558_v9, 0  ;;  %1928 = vmatpush.bf16.msrb.mxu1 %v3724_v8  ;;  %v3723_v9 = vld [vmem:[%s4950_s22 + $0x28] sm:$0xff]  ;;  %v3748_v8 = vld [vmem:[%s4955_s7 + $0xac] sm:$0xf0] }
 0x3df   : > { %v1767_v15 = vsub.f32 %v1757_v37, %v1765_v11  ;;  %1572 = vmatpush.bf16.msrb.mxu3 %v1563_v12  ;;  %v3722_v11 = vld [vmem:[%s4950_s22 + $0x20] sm:$0xff]  ;;  %v3721_v12 = vld [vmem:[%s4950_s22 + $0x18] sm:$0xff] }
 0x3e1   : > { %v3975_v16 = vpop.eup %3974  ;;  %v1770_v18 = vmul.f32 1.442695, %v1767_v15  ;;  %v3719_v15 = vld [vmem:[%s4950_s22 + $0x8] sm:$0xff] }
 0x3e2   : > { %v1663_v19 = vsel %vm1406_vm9, %v3975_v16, 0.0  ;;  %1929 = vmatpush.bf16.msrb.mxu1 %v3723_v9  ;;  %v3746_v9 = vld [vmem:[%s4955_s7 + $0xa4] sm:$0xf] }
 0x3e3   : > { %1687 = vmatpush.bf16.msra.mxu3 %v1678_v14  ;;  %3976 = vpow2.f32 %v1770_v18  ;;  %1664 = vadd.xlane.f32.xlu2 %v1663_v19  ;;  %v3720_v14 = vld [vmem:[%s4950_s22 + $0x10] sm:$0xff] }
 0x3e6   : > { %1930 = vmatpush.bf16.msrb.mxu1 %v3722_v11  ;;  %v3471_v11 = vor.u32 %v3748_v8, %v3470_v6  ;;  %v3390_v6 = vld [vmem:[%s4955_s7] sm:$0xf] }
 0x3e9   : > { %v3977_v20 = vpop.eup %3976 }
 0x3ea   : > { %v1775_v21 = vsel %vm1406_vm9, %v3977_v20, 0.0  ;;  %1931 = vmatpush.bf16.msrb.mxu1 %v3721_v12  ;;  %v3472_v12 = vld [vmem:[%s4955_s7 + $0xb0] sm:$0xf0] }
 0x3eb   : > { %1776 = vadd.xlane.f32.xlu0 %v1775_v21 }
 0x3ee   : > { %1932 = vmatpush.bf16.msrb.mxu1 %v3720_v14  ;;  %v3478_v14 = vld [vmem:[%s4955_s7 + $0xa8] sm:$0xf] }
 0x3f2   : > { %1933 = vmatpush.bf16.msrb.mxu1 %v3719_v15  ;;  %v3749_v15 = vld [vmem:[%s4955_s7 + $0xb4] sm:$0xf0] }
 0x3fb   : > { %1784 = vrot.lane.b32.xlu2 %v5097_v7, %s4609_s28 }
 0x403   : > { %1805 = vrot.lane.b32.xlu2 %v5108_v30, %s4609_s28 }
 0x415   : > { %v1544_v22 = vpop.xlane.xlu0 %1543 }
 0x416   : > { %3978 = vrcp.f32 %v1544_v22 }
 0x41c   : > { %v3979_v23 = vpop.eup %3978 }
 0x41d   : > { %v1550_v24 = vmul.f32 %v3979_v23, %v5118_v41 }
 0x41f   : > { %v1552_v25 = vpack.c.bf16 %v1550_v24, %v1550_v24 }
 0x421   : > { %3346 = vmatmul.msk.bf16.vlgmr.msrb.gmra.mxu3 %vm1406_vm9, %v1552_v25 }
 0x427   : > { %v1662_v26 = vpop.xlane.xlu2 %1661 }
 0x428   : > { %3980 = vrcp.f32 %v1662_v26  ;;  %v1694_v27 = vpop.permute.xlu0 %1693 }
 0x429   : > { %v1699_v28 = vsel %vm1436_vm8, %v1694_v27, 0 }
 0x42a   : > { %1708 = vmatpush.bf16.msrb.mxu0 %v1699_v28 }
 0x42e   : > { %v3981_v29 = vpop.eup %3980 }
 0x42f   : > { %v1668_v7 = vmul.f32 %v3981_v29, %v5122_v46 }
 0x431   : > { %v1670_v31 = vpack.c.bf16 %v1668_v7, %v1668_v7 }
 0x433   : > { %3350 = vmatmul.msk.bf16.vlgmr.msra.gmra.mxu3 %vm1406_vm9, %v1670_v31 }
 0x434   : > { %v1547_v30 = vpop.xlane.xlu2 %1546 }
 0x435   : > { %3982 = vrcp.f32 %v1547_v30 }
 0x43b   : > { %v3983_v33 = vpop.eup %3982 }
 0x43c   : > { %v1551_v34 = vmul.f32 %v3983_v33, %v3969_v56  ;;  %v1774_v38 = vpop.xlane.xlu1 %1773 }
 0x43d   : > { %3984 = vrcp.f32 %v1774_v38 }
 0x43e   : > { %v1553_v35 = vpack.c.bf16 %v1551_v34, %v1551_v34  ;;  %v3948_v34 = vld [vmem:[%s5583_s3] ss:$0 sm:$0xff] }
 0x440   : > { %3347 = vmatmul.msk.bf16.vlgmr.msra.gmra.mxu0 %vm1406_vm9, %v1553_v35 }
 0x443   : > { %v3985_v41 = vpop.eup %3984 }
 0x444   : > { %v5150_v36 = vpop.f32.mrf.mxu3  ;;  %v1780_v43 = vmul.f32 %v3985_v41, %v5130_v13 }
 0x446   : > { %v1782_v49 = vpack.c.bf16 %v1780_v43, %v1780_v43 }
 0x44c   : > { %v1451_v37 = vpop.f32.mrf.mxu3 }
 0x44e   : > { %v5152_v32 = vpop.f32.mrf.mxu0 }
 0x456   : > { %v1665_v39 = vpop.xlane.xlu2 %1664  ;;  %v1470_v40 = vpop.f32.mrf.mxu0 }
 0x457   : > { %3986 = vrcp.f32 %v1665_v39 }
 0x45d   : > { %v3987_v42 = vpop.eup %3986 }
 0x45e   : > { %v1669_v44 = vmul.f32 %v3987_v42, %v3975_v16  ;;  %v1785_v45 = vpop.permute.xlu2 %1784  ;;  %v1777_v48 = vpop.xlane.xlu0 %1776  ;;  %v3718_v16 = vld [vmem:[%s4950_s22] sm:$0xff]  ;;  %s2746_s22 = sld [smem:[#allocation5 + %s5600_s18]] }
 0x45f   : > { %v1790_v46 = vsel %vm1436_vm8, %v1785_v45, 0  ;;  %3988 = vrcp.f32 %v1777_v48  ;;  %1934 = vmatpush.bf16.msrb.mxu1 %v3718_v16  ;;  %v3754_v48 = vld [vmem:[%s4955_s7 + $0xe4] sm:$0xf]  ;;  %v3475_v16 = vor.u32 %v3746_v9, %v3472_v12 }
 0x460   : > { %v1671_v47 = vpack.c.bf16 %v1669_v44, %v1669_v44  ;;  %1799 = vmatpush.bf16.msrb.mxu3 %v1790_v46  ;;  %v3502_v46 = vld [vmem:[%s4955_s7 + $0xe0] sm:$0xf]  ;;  %v3726_v12 = vld [vmem:[%s4955_s7 + $0x4] sm:$0xf] }
 0x462   : > { %3351 = vmatmul.msk.bf16.vlgmr.msrb.gmra.mxu0 %vm1406_vm9, %v1671_v47  ;;  %v3756_v47 = vld [vmem:[%s4955_s7 + $0xec] sm:$0xf0] }
 0x463   : > { %3354 = vmatmul.msk.bf16.vlgmr.msrb.gmra.mxu3 %vm1406_vm9, %v1782_v49  ;;  %v3503_v49 = vor.u32 %v3756_v47, %v3502_v46  ;;  %v3422_v47 = vld [vmem:[%s4955_s7 + $0x40] sm:$0xf] }
 0x464   : > { %p3652_p2 = scmp.eq.s32.totalorder %s2746_s22, 0 }
 0x465   : > { %v3989_v52 = vpop.eup %3988  ;;  %2198 = vmatpush.bf16.msrb.mxu2 %v3503_v49  ;;  %v3734_v49 = vld [vmem:[%s4955_s7 + $0x44] sm:$0xf] }
 0x466   : > { %v1806_v50 = vpop.permute.xlu2 %1805  ;;  %v1781_v53 = vmul.f32 %v3989_v52, %v3977_v20  ;;  %v3757_v52 = vld [vmem:[%s4955_s7 + $0xf4] sm:$0xf0] }
 0x467   : > { %v1811_v51 = vsel %vm1436_vm8, %v1806_v50, 0  ;;  %v3504_v50 = vld [vmem:[%s4955_s7 + $0xf0] sm:$0xf0] }
 0x468   : > { %1820 = vmatpush.bf16.msra.mxu0 %v1811_v51  ;;  %v1783_v54 = vpack.c.bf16 %v1781_v53, %v1781_v53  ;;  %v3510_v51 = vld [vmem:[%s4955_s7 + $0xe8] sm:$0xf]  ;;  %v3507_v53 = vor.u32 %v3754_v48, %v3504_v50  ;;  %v3736_v48 = vld [vmem:[%s4955_s7 + $0x4c] sm:$0xf0] }
 0x469   : > { %v3423_v50 = vor.u32 %v3736_v48, %v3422_v47  ;;  %v3950_v48 = vld [vmem:[%s5585_s19] ss:$0 sm:$0xff] }
 0x46a   : > { %2212 = vmatpush.bf16.msra.mxu3 %v3507_v53  ;;  %v3737_v53 = vld [vmem:[%s4955_s7 + $0x54] sm:$0xf0] }
 0x472   : > { %3355 = vmatmul.msk.bf16.vlgmr.msra.gmra.mxu0 %vm1406_vm9, %v1783_v54  ;;  %v3511_v54 = vor.u32 %v3757_v52, %v3510_v51  ;;  %v3424_v51 = vld [vmem:[%s4955_s7 + $0x50] sm:$0xf0]  ;;  %v3430_v52 = vld [vmem:[%s4955_s7 + $0x48] sm:$0xf] }
 0x474   : > { %2226 = vmatpush.bf16.msrb.mxu0 %v3511_v54  ;;  %v3427_v54 = vor.u32 %v3734_v49, %v3424_v51 }
 0x4a4   : > { %v1574_v55 = vpop.f32.mrf.mxu3 }
 0x4ac   : > { %v1576_v56 = vpop.f32.mrf.mxu3 }
 0x4ad   : > { %v3512_v56 = vld [vmem:[%s4955_s7 + $0xf8] sm:$0xf0] }
 0x4b6   : > { %v1689_v57 = vpop.f32.mrf.mxu3 }
 0x4bd   : > { %v1598_v58 = vpop.f32.mrf.mxu0 }
 0x4be   : > { %v3931_v59 = vpack.i.bf16 %v1598_v58, %v1574_v55  ;;  %v1691_v60 = vpop.f32.mrf.mxu3  ;;  %v3755_v55 = vld [vmem:[%s4955_s7 + $0xec] sm:$0xf]  ;;  %v3486_v58 = vld [vmem:[%s4955_s7 + $0xc0] sm:$0xf] }
 0x4bf   : > { %v3750_v60 = vld [vmem:[%s4955_s7 + $0xc4] sm:$0xf] }
 0x4c0   : > { %3932 = vrot.lane.b32.xlu2 %v3931_v59, %s4609_s28  ;;  %v3752_v59 = vld [vmem:[%s4955_s7 + $0xcc] sm:$0xf0] }
 0x4c5   : > { %v1600_v13 = vpop.f32.mrf.mxu0 }
 0x4c6   : > { %v3487_v13 = vor.u32 %v3752_v59, %v3486_v58  ;;  %v3406_v59 = vld [vmem:[%s4955_s7 + $0x20] sm:$0xf] }
 0x4c8   : > { %2199 = vmatpush.bf16.msrb.mxu2 %v3487_v13  ;;  %v3730_v13 = vld [vmem:[%s4955_s7 + $0x24] sm:$0xf] }
 0x4cc   : > { %2200 = vmatpush.bf16.msrb.mxu2 %v3471_v11  ;;  %v3728_v11 = vld [vmem:[%s4955_s7 + $0xc] sm:$0xf0] }
 0x4df   : > { %v1710_v61 = vpop.f32.mrf.mxu0 }
 0x4e0   : > { %v3936_v62 = vpack.i.bf16 %v1710_v61, %v1689_v57  ;;  %v3515_v57 = vor.u32 %v3755_v55, %v3512_v56  ;;  %v3488_v61 = vld [vmem:[%s4955_s7 + $0xd0] sm:$0xf0]  ;;  %v3431_v55 = vor.u32 %v3737_v53, %v3430_v52  ;;  %v3735_v56 = vld [vmem:[%s4955_s7 + $0x4c] sm:$0xf]  ;;  %v5270_v52 = vld [vmem:[%s4957_s5] sm:$0xf] }
 0x4e1   : > { %v3781_v53 = vld [vmem:[%s4959_s27 + $0xb8] sm:$0xff] }
 0x4e2   : > { %3937 = vrot.lane.b32.xlu1 %v3936_v62, %s4608_s25  ;;  %2240 = vmatpush.bf16.msra.mxu1 %v3515_v57  ;;  %v3494_v62 = vld [vmem:[%s4955_s7 + $0xc8] sm:$0xf]  ;;  %v3432_v57 = vld [vmem:[%s4955_s7 + $0x58] sm:$0xf0] }
 0x4e3   : > { %v3435_v58 = vor.u32 %v3735_v56, %v3432_v57  ;;  %v3780_v56 = vld [vmem:[%s4959_s27 + $0xb0] sm:$0xff] }
 0x4e4   : > { %v3788_v57 = vld [vmem:[%s4959_s27 + $0xf0] sm:$0xff] }
 0x4e6   : > { %v1801_v63 = vpop.f32.mrf.mxu3 }
 0x4e7   : > { %v1712_v0 = vpop.f32.mrf.mxu0 }
 0x4e8   : > { %v3491_v0 = vor.u32 %v3750_v60, %v3488_v61  ;;  %v3732_v60 = vld [vmem:[%s4955_s7 + $0x2c] sm:$0xf0] }
 0x4e9   : > { %v3407_v61 = vor.u32 %v3732_v60, %v3406_v59 }
 0x4ea   : > { %2213 = vmatpush.bf16.msra.mxu3 %v3491_v0  ;;  %v3733_v0 = vld [vmem:[%s4955_s7 + $0x34] sm:$0xf0] }
 0x4ee   : > { %v1803_v1 = vpop.f32.mrf.mxu3  ;;  %2214 = vmatpush.bf16.msra.mxu3 %v3475_v16  ;;  %v3391_v16 = vor.u32 %v3728_v11, %v3390_v6 }
 0x4ef   : > { %v1822_v4 = vpop.f32.mrf.mxu0 }
 0x4f0   : > { %v3941_v5 = vpack.i.bf16 %v1822_v4, %v1801_v63  ;;  %v3753_v63 = vld [vmem:[%s4955_s7 + $0xd4] sm:$0xf0]  ;;  %v3751_v4 = vld [vmem:[%s4955_s7 + $0xcc] sm:$0xf] }
 0x4f1   : > { %v3495_v1 = vor.u32 %v3753_v63, %v3494_v62  ;;  %v3408_v62 = vld [vmem:[%s4955_s7 + $0x30] sm:$0xf0]  ;;  %v3414_v63 = vld [vmem:[%s4955_s7 + $0x28] sm:$0xf] }
 0x4f2   : > { %3942 = vrot.lane.b32.xlu2 %v3941_v5, %s4607_s8  ;;  %v3496_v5 = vld [vmem:[%s4955_s7 + $0xd8] sm:$0xf0] }
 0x4f3   : > { %2227 = vmatpush.bf16.msrb.mxu0 %v3495_v1  ;;  %v3411_v1 = vor.u32 %v3730_v13, %v3408_v62  ;;  %v3773_v62 = vld [vmem:[%s4959_s27 + $0x78] sm:$0xff] }
 0x4f7   : > { %v1824_v17 = vpop.f32.mrf.mxu0 }
 0x4f8   : > { %v3499_v17 = vor.u32 %v3751_v4, %v3496_v5  ;;  %v3415_v4 = vor.u32 %v3733_v0, %v3414_v63  ;;  %v3731_v5 = vld [vmem:[%s4955_s7 + $0x2c] sm:$0xf]  ;;  %v2030_v63 = vperm.slane %v5270_v52, 0  ;;  %v2031_v0 = vperm.slane %v5270_v52, 1 }
 0x4fa   : > { %2241 = vmatpush.bf16.msra.mxu1 %v3499_v17  ;;  %v3416_v17 = vld [vmem:[%s4955_s7 + $0x38] sm:$0xf0] }
 0x4fb   : > { %v3419_v9 = vor.u32 %v3731_v5, %v3416_v17  ;;  %v3779_v5 = vld [vmem:[%s4959_s27 + $0xa8] sm:$0xff] }
 0x4fc   : > { %v3787_v17 = vld [vmem:[%s4959_s27 + $0xe8] sm:$0xff] }
 0x51a   : > { %v3933_v18 = vpop.permute.xlu2 %3932 }
 0x51b   : > { %v3935_v19 = vunpack.i.h.bf16 %v3933_v18  ;;  %v3934_v20 = vunpack.i.l.bf16 %v3933_v18  ;;  %v3479_v18 = vor.u32 %v3749_v15, %v3478_v14  ;;  %v3392_v14 = vld [vmem:[%s4955_s7 + $0x10] sm:$0xf0] }
 0x51d   : > { %v1851_v25 = vsel %vm1367_vm7, %v5152_v32, %v3935_v19  ;;  %v1850_v26 = vsel %vm1367_vm7, %v5150_v36, %v3934_v20  ;;  %v3747_v19 = vld [vmem:[%s4955_s7 + $0xac] sm:$0xf]  ;;  %v3480_v20 = vld [vmem:[%s4955_s7 + $0xb8] sm:$0xf0]  ;;  %2228 = vmatpush.bf16.msrb.mxu0 %v3479_v18  ;;  %v3395_v18 = vor.u32 %v3726_v12, %v3392_v14 }
 0x51e   : > { %v3764_v12 = vld [vmem:[%s4959_s27 + $0x30] sm:$0xff] }
 0x51f   : > { %v3772_v14 = vld [vmem:[%s4959_s27 + $0x70] sm:$0xff] }
 0x54c   : > { %v3943_v21 = vpop.permute.xlu2 %3942 }
 0x54d   : > { %v3945_v27 = vunpack.i.h.bf16 %v3943_v21  ;;  %v3944_v28 = vunpack.i.l.bf16 %v3943_v21  ;;  %v3483_v21 = vor.u32 %v3747_v19, %v3480_v20  ;;  %v3398_v19 = vld [vmem:[%s4955_s7 + $0x8] sm:$0xf]  ;;  %v3729_v20 = vld [vmem:[%s4955_s7 + $0x14] sm:$0xf0] }
 0x54f   : > { %2242 = vmatpush.bf16.msra.mxu1 %v3483_v21  ;;  %v3727_v21 = vld [vmem:[%s4955_s7 + $0xc] sm:$0xf] }
 0x554   : > { %v3938_v22 = vpop.permute.xlu1 %3937 }
 0x555   : > { %v3940_v23 = vunpack.i.h.bf16 %v3938_v22  ;;  %v3939_v24 = vunpack.i.l.bf16 %v3938_v22  ;;  %v3454_v22 = vld [vmem:[%s4955_s7 + $0x80] sm:$0xf] }
 0x557   : > { %v1854_v29 = vsel %vm1852_vm10, %v1851_v25, %v3940_v23  ;;  %v1853_v7 = vsel %vm1852_vm10, %v1850_v26, %v3939_v24  ;;  %v3744_v23 = vld [vmem:[%s4955_s7 + $0x8c] sm:$0xf0]  ;;  %v3742_v24 = vld [vmem:[%s4955_s7 + $0x84] sm:$0xf]  ;;  %v3456_v26 = vld [vmem:[%s4955_s7 + $0x90] sm:$0xf0] }
 0x558   : > { %v1857_v31 = vsel %vm1855_vm11, %v1854_v29, %v3945_v27  ;;  %v1856_v30 = vsel %vm1855_vm11, %v1853_v7, %v3944_v28  ;;  %v3455_v25 = vor.u32 %v3744_v23, %v3454_v22  ;;  %v3462_v27 = vld [vmem:[%s4955_s7 + $0x88] sm:$0xf]  ;;  %v3745_v28 = vld [vmem:[%s4955_s7 + $0x94] sm:$0xf0]  ;;  %v3459_v29 = vor.u32 %v3742_v24, %v3456_v26  ;;  %v3400_v23 = vld [vmem:[%s4955_s7 + $0x18] sm:$0xf0] }
 0x559   : > { %v1858_v33 = vpack.c.bf16 %v1857_v31, %v1856_v30  ;;  %v3463_v7 = vor.u32 %v3745_v28, %v3462_v27  ;;  %v3743_v31 = vld [vmem:[%s4955_s7 + $0x8c] sm:$0xf]  ;;  %v3464_v30 = vld [vmem:[%s4955_s7 + $0x98] sm:$0xf0]  ;;  %v3399_v22 = vor.u32 %v3729_v20, %v3398_v19 }
 0x55a   : > { %2201 = vmatpush.bf16.msrb.mxu2 %v3455_v25  ;;  %2215 = vmatpush.bf16.msra.mxu3 %v3459_v29  ;;  %v3403_v25 = vor.u32 %v3727_v21, %v3400_v23  ;;  %v3786_v19 = vld [vmem:[%s4959_s27 + $0xe0] sm:$0xff] }
 0x55b   : > { %1935 = vmatmul.bf16.vlgmr.msrb.gmra.mxu1 %v1858_v33  ;;  %v3467_v33 = vor.u32 %v3743_v31, %v3464_v30  ;;  %2229 = vmatpush.bf16.msrb.mxu0 %v3463_v7 }
 0x55d   : > { %2243 = vmatpush.bf16.msra.mxu1 %v3467_v33 }
 0x5d8   : > { %v1936_v35 = vpop.f32.mrf.mxu1 }
 0x5d9   : > { %v1937_v37 = vadd.f32 %v3948_v34, %v1936_v35  ;;  %v3740_v35 = vld [vmem:[%s4955_s7 + $0x6c] sm:$0xf0] }
 0x5db   : > { %v5178_v38 = vadd.f32 %v1937_v37, %v4973_v2  ;;  %v3738_v37 = vld [vmem:[%s4955_s7 + $0x64] sm:$0xf] }
 0x5dd   : > { %1945 = vadd.xlane.f32.xlu0 %v5178_v38 }
 0x5e0   : > { %v1938_v36 = vpop.f32.mrf.mxu1 }
 0x5e1   : > { %v1939_v32 = vadd.f32 %v3948_v34, %v1938_v36  ;;  %v3438_v34 = vld [vmem:[%s4955_s7 + $0x60] sm:$0xf] }
 0x5e2   : > { %v3439_v36 = vor.u32 %v3740_v35, %v3438_v34 }
 0x5e3   : > { %v5182_v39 = vadd.f32 %v1939_v32, %v4976_v3  ;;  %v3440_v32 = vld [vmem:[%s4955_s7 + $0x70] sm:$0xf0] }
 0x5e4   : > { %2202 = vmatpush.bf16.msrb.mxu2 %v3439_v36 }
 0x5e5   : > { %1947 = vadd.xlane.f32.xlu2 %v5182_v39 }
 0x5e8   : > { %2203 = vmatpush.bf16.msrb.mxu2 %v3423_v50 }
 0x5ec   : > { %2204 = vmatpush.bf16.msrb.mxu2 %v3407_v61  ;;  %v3765_v61 = vld [vmem:[%s4959_s27 + $0x38] sm:$0xff] }
 0x5f0   : > { %2205 = vmatpush.bf16.msrb.mxu2 %v3391_v16 }
 0x5f4   : > { %2686 = vmatpush.bf16.msra.mxu2 %v3765_v61 }
 0x5f8   : > { %2687 = vmatpush.bf16.msra.mxu2 %v3764_v12 }
 0x650   : > { %v1946_v40 = vpop.xlane.xlu0 %1945 }
 0x651   : > { %v1949_v41 = vmul.f32 %v1946_v40, %v4979_v10  ;;  %v3446_v40 = vld [vmem:[%s4955_s7 + $0x68] sm:$0xf] }
 0x653   : > { %v5187_v2 = vsub.f32 %v5178_v38, %v1949_v41  ;;  %v3741_v41 = vld [vmem:[%s4955_s7 + $0x74] sm:$0xf0] }
 0x655   : > { %v1953_v42 = vmul.f32 %v5187_v2, %v5187_v2 }
 0x657   : > { %1955 = vadd.xlane.f32.xlu0 %v1953_v42  ;;  %v3443_v42 = vor.u32 %v3738_v37, %v3440_v32 }
 0x658   : > { %v1948_v43 = vpop.xlane.xlu2 %1947 }
 0x659   : > { %v1950_v3 = vmul.f32 %v1948_v43, %v4979_v10  ;;  %v3447_v43 = vor.u32 %v3741_v41, %v3446_v40  ;;  %2216 = vmatpush.bf16.msra.mxu3 %v3443_v42 }
 0x65b   : > { %v5193_v44 = vsub.f32 %v5182_v39, %v1950_v3  ;;  %v3739_v3 = vld [vmem:[%s4955_s7 + $0x6c] sm:$0xf]  ;;  %2230 = vmatpush.bf16.msrb.mxu0 %v3447_v43  ;;  %v3949_v43 = vld [vmem:[%s5584_s20] ss:$0 sm:$0xff] }
 0x65d   : > { %v1954_v45 = vmul.f32 %v5193_v44, %v5193_v44  ;;  %2217 = vmatpush.bf16.msra.mxu3 %v3427_v54  ;;  %v3789_v54 = vld [vmem:[%s4959_s27 + $0xf8] sm:$0xff] }
 0x65f   : > { %1957 = vadd.xlane.f32.xlu0 %v1954_v45  ;;  %v3448_v45 = vld [vmem:[%s4955_s7 + $0x78] sm:$0xf0]  ;;  %2231 = vmatpush.bf16.msrb.mxu0 %v3431_v55  ;;  %v2033_v55 = vperm.slane %v5270_v52, 3 }
 0x660   : > { %v3451_v46 = vor.u32 %v3739_v3, %v3448_v45 }
 0x661   : > { %2218 = vmatpush.bf16.msra.mxu3 %v3411_v1 }
 0x662   : > { %2244 = vmatpush.bf16.msra.mxu1 %v3451_v46 }
 0x663   : > { %2232 = vmatpush.bf16.msrb.mxu0 %v3415_v4 }
 0x665   : > { %2219 = vmatpush.bf16.msra.mxu3 %v3395_v18  ;;  %v3778_v18 = vld [vmem:[%s4959_s27 + $0xa0] sm:$0xff] }
 0x666   : > { %2245 = vmatpush.bf16.msra.mxu1 %v3435_v58 }
 0x667   : > { %2233 = vmatpush.bf16.msrb.mxu0 %v3399_v22 }
 0x669   : > { %2700 = vmatpush.bf16.msrb.mxu3 %v3773_v62 }
 0x66a   : > { %2246 = vmatpush.bf16.msra.mxu1 %v3419_v9 }
 0x66b   : > { %2714 = vmatpush.bf16.msra.mxu0 %v3781_v53 }
 0x66d   : > { %2701 = vmatpush.bf16.msrb.mxu3 %v3772_v14 }
 0x66e   : > { %2247 = vmatpush.bf16.msra.mxu1 %v3403_v25 }
 0x66f   : > { %2715 = vmatpush.bf16.msra.mxu0 %v3780_v56  ;;  %v3760_v56 = vld [vmem:[%s4959_s27 + $0x10] sm:$0xff] }
 0x672   : > { %2728 = vmatpush.bf16.msrb.mxu1 %v3789_v54 }
 0x673   : > { %2716 = vmatpush.bf16.msra.mxu0 %v3779_v5 }
 0x676   : > { %2729 = vmatpush.bf16.msrb.mxu1 %v3788_v57  ;;  %v3768_v57 = vld [vmem:[%s4959_s27 + $0x50] sm:$0xff] }
 0x677   : > { %2717 = vmatpush.bf16.msra.mxu0 %v3778_v18 }
 0x67a   : > { %2730 = vmatpush.bf16.msrb.mxu1 %v3787_v17 }
 0x67e   : > { %2731 = vmatpush.bf16.msrb.mxu1 %v3786_v19 }
 0x6ca   : > { %v1956_v8 = vpop.xlane.xlu0 %1955 }
 0x6cb   : > { %v1959_v15 = vmul.f32 %v1956_v8, %v4979_v10 }
 0x6cd   : > { %v1961_v24 = vadd.f32 1e-05, %v1959_v15 }
 0x6cf   : > { %3990 = vrsqrt.f32 %v1961_v24  ;;  %vm1969_vm13 = vweird.f32 %v1961_v24 }
 0x6d2   : > { %v1958_v26 = vpop.xlane.xlu0 %1957 }
 0x6d3   : > { %v1960_v27 = vmul.f32 %v1958_v26, %v4979_v10  ;;  %v3763_v26 = vld [vmem:[%s4959_s27 + $0x28] sm:$0xff] }
 0x6d4   : > { %2688 = vmatpush.bf16.msra.mxu2 %v3763_v26 }
 0x6d5   : > { %v3991_v28 = vpop.eup %3990  ;;  %v1962_v29 = vadd.f32 1e-05, %v1960_v27  ;;  %v3771_v27 = vld [vmem:[%s4959_s27 + $0x68] sm:$0xff] }
 0x6d6   : > { %v1964_v7 = vmul.f32 %v3991_v28, %v1961_v24  ;;  %vm1970_vm12 = vweird.f32 %v3991_v28  ;;  %2702 = vmatpush.bf16.msrb.mxu3 %v3771_v27 }
 0x6d7   : > { %3992 = vrsqrt.f32 %v1962_v29  ;;  %vm1971_vm14 = vmor %vm1969_vm13, %vm1970_vm12  ;;  %vm1979_vm0 = vweird.f32 %v1962_v29 }
 0x6d8   : > { %v1965_v31 = vmul.f32 %v3991_v28, %v1964_v7 }
 0x6da   : > { %v1966_v30 = vmul.f32 0.5, %v1965_v31 }
 0x6dc   : > { %v1967_v33 = vsub.f32 1.5, %v1966_v30  ;;  %v3777_v30 = vld [vmem:[%s4959_s27 + $0x98] sm:$0xff] }
 0x6dd   : > { %v3993_v34 = vpop.eup %3992  ;;  %2718 = vmatpush.bf16.msra.mxu0 %v3777_v30 }
 0x6de   : > { %v1968_v35 = vmul.f32 %v3991_v28, %v1967_v33  ;;  %v1974_v37 = vmul.f32 %v3993_v34, %v1962_v29  ;;  %vm1980_vm15 = vweird.f32 %v3993_v34  ;;  %v3785_v33 = vld [vmem:[%s4959_s27 + $0xd8] sm:$0xff] }
 0x6df   : > { %vm1981_vm1 = vmor %vm1979_vm0, %vm1980_vm15  ;;  %2732 = vmatpush.bf16.msrb.mxu1 %v3785_v33 }
 0x6e0   : > { %v1975_v36 = vmul.f32 %v3993_v34, %v1974_v37  ;;  %v1972_v32 = vsel %vm1971_vm14, %v3991_v28, %v1968_v35 }
 0x6e1   : > { %v1983_v42 = vmul.f32 %v1972_v32, %v5187_v2  ;;  %v3770_v32 = vld [vmem:[%s4959_s27 + $0x60] sm:$0xff] }
 0x6e2   : > { %v1976_v40 = vmul.f32 0.5, %v1975_v36  ;;  %v3762_v36 = vld [vmem:[%s4959_s27 + $0x20] sm:$0xff]  ;;  %2703 = vmatpush.bf16.msrb.mxu3 %v3770_v32 }
 0x6e3   : > { %v1988_v47 = vmul.f32 %v3949_v43, %v1983_v42  ;;  %2689 = vmatpush.bf16.msra.mxu2 %v3762_v36 }
 0x6e4   : > { %v1977_v41 = vsub.f32 1.5, %v1976_v40 }
 0x6e5   : > { %v1993_v50 = vadd.f32 %v3950_v48, %v1988_v47  ;;  %v3761_v47 = vld [vmem:[%s4959_s27 + $0x18] sm:$0xff] }
 0x6e6   : > { %v1978_v3 = vmul.f32 %v3993_v34, %v1977_v41 }
 0x6e7   : > { %2690 = vmatpush.bf16.msra.mxu2 %v3761_v47 }
 0x6e8   : > { %v1982_v45 = vsel %vm1981_vm1, %v3993_v34, %v1978_v3 }
 0x6e9   : > { %v1984_v46 = vmul.f32 %v1982_v45, %v5193_v44  ;;  %v2032_v44 = vperm.slane %v5270_v52, 2  ;;  %v3776_v45 = vld [vmem:[%s4959_s27 + $0x90] sm:$0xff]  ;;  %v3767_v52 = vld [vmem:[%s4959_s27 + $0x48] sm:$0xff] }
 0x6ea   : > { %2719 = vmatpush.bf16.msra.mxu0 %v3776_v45 }
 0x6eb   : > { %v1989_v49 = vmul.f32 %v3949_v43, %v1984_v46  ;;  %v3784_v46 = vld [vmem:[%s4959_s27 + $0xd0] sm:$0xff]  ;;  %2691 = vmatpush.bf16.msra.mxu2 %v3760_v56 }
 0x6ec   : > { %2733 = vmatpush.bf16.msrb.mxu1 %v3784_v46 }
 0x6ed   : > { %v1994_v51 = vadd.f32 %v3950_v48, %v1989_v49  ;;  %v3769_v48 = vld [vmem:[%s4959_s27 + $0x58] sm:$0xff] }
 0x6ee   : > { %2704 = vmatpush.bf16.msrb.mxu3 %v3769_v48 }
 0x6ef   : > { %v1995_v2 = vpack.c.bf16 %v1994_v51, %v1993_v50 }
 0x6f1   : > { %2206 = vmatmul.bf16.vlgmr.msrb.gmra.mxu2 %v1995_v2  ;;  %2220 = vmatmul.bf16.vlgmr.msra.gmra.mxu3 %v1995_v2 }
 0x6f2   : > { %2234 = vmatmul.bf16.vlgmr.msrb.gmra.mxu0 %v1995_v2  ;;  %2248 = vmatmul.bf16.vlgmr.msra.gmra.mxu1 %v1995_v2  ;;  %v3775_v2 = vld [vmem:[%s4959_s27 + $0x88] sm:$0xff] }
 0x6f3   : > { %2720 = vmatpush.bf16.msra.mxu0 %v3775_v2  ;;  %2705 = vmatpush.bf16.msrb.mxu3 %v3768_v57 }
 0x6f7   : > { %2706 = vmatpush.bf16.msrb.mxu3 %v3767_v52 }
 0x76f   : > { %v2235_v58 = vpop.f32.mrf.mxu0  ;;  %v2249_v59 = vpop.f32.mrf.mxu1 }
 0x770   : > { %v5278_v60 = vadd.f32 %v2235_v58, %v2032_v44  ;;  %v5280_v13 = vadd.f32 %v2249_v59, %v2033_v55 }
 0x772   : > { %v3518_v1 = vmul.f32 -1.702, %v5278_v60  ;;  %v3519_v4 = vmul.f32 -1.702, %v5280_v13 }
 0x774   : > { %v2274_v6 = vmul.f32 1.442695, %v3518_v1  ;;  %v2276_v8 = vmul.f32 1.442695, %v3519_v4  ;;  %v2207_v9 = vpop.f32.mrf.mxu2  ;;  %v2221_v11 = vpop.f32.mrf.mxu3  ;;  %v3774_v1 = vld [vmem:[%s4959_s27 + $0x80] sm:$0xff] }
 0x775   : > { %v5292_v15 = vadd.f32 %v2207_v9, %v2030_v63  ;;  %v5296_v16 = vadd.f32 %v2221_v11, %v2031_v0  ;;  %v3782_v4 = vld [vmem:[%s4959_s27 + $0xc0] sm:$0xff]  ;;  %2721 = vmatpush.bf16.msra.mxu0 %v3774_v1  ;;  %v3759_v11 = vld [vmem:[%s4959_s27 + $0x8] sm:$0xff] }
 0x776   : > { %3994 = vpow2.f32 %v2274_v6  ;;  %2692 = vmatpush.bf16.msra.mxu2 %v3759_v11 }
 0x777   : > { %3996 = vpow2.f32 %v2276_v8  ;;  %v3516_v20 = vmul.f32 -1.702, %v5292_v15  ;;  %v3517_v21 = vmul.f32 -1.702, %v5296_v16  ;;  %v2237_v22 = vpop.f32.mrf.mxu0  ;;  %v2251_v23 = vpop.f32.mrf.mxu1 }
 0x778   : > { %v5302_v24 = vadd.f32 %v2237_v22, %v2032_v44  ;;  %v5304_v25 = vadd.f32 %v2251_v23, %v2033_v55  ;;  %v3783_v44 = vld [vmem:[%s4959_s27 + $0xc8] sm:$0xff]  ;;  %v3766_v22 = vld [vmem:[%s4959_s27 + $0x40] sm:$0xff] }
 0x779   : > { %v2270_v28 = vmul.f32 1.442695, %v3516_v20  ;;  %v2272_v29 = vmul.f32 1.442695, %v3517_v21  ;;  %2734 = vmatpush.bf16.msrb.mxu1 %v3783_v44  ;;  %v3758_v21 = vld [vmem:[%s4959_s27] sm:$0xff]  ;;  %2707 = vmatpush.bf16.msrb.mxu3 %v3766_v22 }
 0x77a   : > { %v3522_v7 = vmul.f32 -1.702, %v5302_v24  ;;  %v3523_v31 = vmul.f32 -1.702, %v5304_v25  ;;  %2693 = vmatpush.bf16.msra.mxu2 %v3758_v21 }
 0x77b   : > { %3998 = vpow2.f32 %v2270_v28 }
 0x77c   : > { %v3995_v34 = vpop.eup %3994  ;;  %v2282_v35 = vmul.f32 1.442695, %v3522_v7  ;;  %v2209_v37 = vpop.f32.mrf.mxu2  ;;  %4000 = vpow2.f32 %v2272_v29  ;;  %v2284_v42 = vmul.f32 1.442695, %v3523_v31 }
 0x77d   : > { %v3997_v40 = vpop.eup %3996  ;;  %v5314_v41 = vadd.f32 1.0, %v3995_v34  ;;  %v5316_v43 = vadd.f32 %v2209_v37, %v2030_v63  ;;  %v2223_v54 = vpop.f32.mrf.mxu3  ;;  %2735 = vmatpush.bf16.msrb.mxu1 %v3782_v4 }
 0x77e   : > { %v5318_v3 = vadd.f32 1.0, %v3997_v40  ;;  %4002 = vpow2.f32 %v2282_v35  ;;  %v5342_v63 = vadd.f32 %v2223_v54, %v2031_v0 }
 0x77f   : > { %4004 = vrcp.f32 %v5314_v41  ;;  %v3520_v50 = vmul.f32 -1.702, %v5316_v43  ;;  %v2333_v20 = vand.u32 2147483647, %v5314_v41  ;;  %v2335_v23 = vand.u32 2147483648, %v5314_v41 }
 0x780   : > { %4006 = vrcp.f32 %v5318_v3  ;;  %v3521_v12 = vmul.f32 -1.702, %v5342_v63  ;;  %v2348_v26 = vand.u32 2147483647, %v5318_v3  ;;  %v2350_v27 = vand.u32 2147483648, %v5318_v3 }
 0x781   : > { %v3999_v49 = vpop.eup %3998  ;;  %4008 = vpow2.f32 %v2284_v42  ;;  %v2278_v59 = vmul.f32 1.442695, %v3520_v50  ;;  %vm2329_vm3 = vweird.f32 %v5314_v41  ;;  %vm5375_vm4 = vcmp.eq.f32.partialorder %v2333_v20, 8.507059e+37 }
 0x782   : > { %v5327_v51 = vadd.f32 1.0, %v3999_v49  ;;  %v4001_v53 = vpop.eup %4000  ;;  %v2280_v28 = vmul.f32 1.442695, %v3521_v12  ;;  %vm2344_vm5 = vweird.f32 %v5318_v3  ;;  %v2336_v35 = vor.u32 1.1754944e-38, %v2335_v23 }
 0x783   : > { %v5348_v8 = vadd.f32 1.0, %v4001_v53  ;;  %vm5380_vm6 = vcmp.eq.f32.partialorder %v2348_v26, 8.507059e+37  ;;  %v2351_v36 = vor.u32 1.1754944e-38, %v2350_v27 }
 0x784   : > { %v4003_v55 = vpop.eup %4002  ;;  %4010 = vrcp.f32 %v5327_v51  ;;  %v2305_v2 = vand.u32 2147483648, %v5327_v51  ;;  %v2303_v27 = vand.u32 2147483647, %v5327_v51 }
 0x785   : > { %v5333_v58 = vpop.eup %4004  ;;  %v5350_v9 = vadd.f32 1.0, %v4003_v55  ;;  %4012 = vpow2.f32 %v2278_v59 }
 0x786   : > { %v5335_v61 = vpop.eup %4006  ;;  %v2325_v62 = vmul.f32 %v5333_v58, %v5314_v41  ;;  %vm2330_vm2 = vweird.f32 %v5333_v58 }
 0x787   : > { %v4009_v5 = vpop.eup %4008  ;;  %v2340_v17 = vmul.f32 %v5335_v61, %v5318_v3  ;;  %4014 = vrcp.f32 %v5350_v9  ;;  %vm5387_vm7 = vmor %vm2329_vm3, %vm2330_vm2  ;;  %vm2345_vm8 = vweird.f32 %v5335_v61  ;;  %v2393_v41 = vand.u32 2147483647, %v5350_v9 }
 0x788   : > { %v2326_v6 = vsub.f32 1.0, %v2325_v62  ;;  %v5354_v0 = vadd.f32 1.0, %v4009_v5  ;;  %4016 = vrcp.f32 %v5348_v8  ;;  %vm2389_vm9 = vweird.f32 %v5350_v9  ;;  %vm5412_vm11 = vmor %vm2344_vm5, %vm2345_vm8 }
 0x789   : > { %v2341_v18 = vsub.f32 1.0, %v2340_v17  ;;  %v2395_v53 = vand.u32 2147483648, %v5350_v9  ;;  %vm5417_vm13 = vcmp.eq.f32.partialorder %v2393_v41, 8.507059e+37  ;;  %vm2299_vm2 = vweird.f32 %v5327_v51 }
 0x78a   : > { %v2327_v14 = vmul.f32 %v5333_v58, %v2326_v6  ;;  %v5359_v19 = vpop.eup %4010  ;;  %4018 = vrcp.f32 %v5354_v0  ;;  %v2410_v3 = vand.u32 2147483648, %v5354_v0  ;;  %v2408_v11 = vand.u32 2147483647, %v5354_v0 }
 0x78b   : > { %v4013_v29 = vpop.eup %4012  ;;  %v2342_v31 = vmul.f32 %v5335_v61, %v2341_v18  ;;  %v2295_v30 = vmul.f32 %v5359_v19, %v5327_v51  ;;  %4020 = vpow2.f32 %v2280_v28  ;;  %vm2300_vm12 = vweird.f32 %v5359_v19 }
 0x78c   : > { %v2328_v7 = vadd.f32 %v5333_v58, %v2327_v14  ;;  %v5393_v45 = vadd.f32 1.0, %v4013_v29  ;;  %v2396_v17 = vor.u32 1.1754944e-38, %v2395_v53  ;;  %vm2404_vm0 = vweird.f32 %v5354_v0 }
 0x78d   : > { %v4015_v33 = vpop.eup %4014  ;;  %v2343_v48 = vadd.f32 %v5335_v61, %v2342_v31  ;;  %v2296_v49 = vsub.f32 1.0, %v2295_v30  ;;  %v2411_v26 = vor.u32 1.1754944e-38, %v2410_v3  ;;  %vm2409_vm3 = vcmp.eq.f32.partialorder %v2408_v11, 8.507059e+37 }
 0x78e   : > { %v2385_v32 = vmul.f32 %v4015_v33, %v5350_v9  ;;  %v5385_v40 = vpop.eup %4016  ;;  %v2332_v47 = vsel %vm5387_vm7, %v5333_v58, %v2328_v7  ;;  %vm2390_vm10 = vweird.f32 %v4015_v33  ;;  %4022 = vrcp.f32 %v5393_v45 }
 0x78f   : > { %v2310_v44 = vmul.f32 %v5385_v40, %v5348_v8  ;;  %v2337_v56 = vsel %vm5375_vm4, %v2336_v35, %v2332_v47  ;;  %v2347_v62 = vsel %vm5412_vm11, %v5335_v61, %v2343_v48  ;;  %v2297_v1 = vmul.f32 %v5359_v19, %v2296_v49  ;;  %vm2391_vm14 = vmor %vm2389_vm9, %vm2390_vm10 }
 0x790   : > { %v4019_v46 = vpop.eup %4018  ;;  %v2386_v50 = vsub.f32 1.0, %v2385_v32  ;;  %v2416_v61 = vmul.f32 %v2337_v56, %v5278_v60  ;;  %v2352_v18 = vsel %vm5380_vm6, %v2351_v36, %v2347_v62  ;;  %vm5447_vm4 = vmor %vm2299_vm2, %vm2300_vm12  ;;  %v2306_v51 = vor.u32 1.1754944e-38, %v2305_v2 }
 0x791   : > { %v2400_v54 = vmul.f32 %v4019_v46, %v5354_v0  ;;  %v4021_v5 = vpop.eup %4020  ;;  %vm2405_vm15 = vweird.f32 %v4019_v46  ;;  %v2311_v52 = vsub.f32 1.0, %v2310_v44  ;;  %v2298_v22 = vadd.f32 %v5359_v19, %v2297_v1 }
 0x792   : > { %v2387_v55 = vmul.f32 %v4015_v33, %v2386_v50  ;;  %v5430_v14 = vadd.f32 1.0, %v4021_v5  ;;  %vm2406_vm1 = vmor %vm2404_vm0, %vm2405_vm15  ;;  %v2417_v31 = vmul.f32 %v2352_v18, %v5280_v13  ;;  %v2365_v35 = vand.u32 2147483648, %v5393_v45  ;;  %v3951_v5 = vld [vmem:[%s966_s26] ss:$0 sm:$0xff] }
 0x793   : > { %v2401_v59 = vsub.f32 1.0, %v2400_v54  ;;  %v2312_v28 = vmul.f32 %v5385_v40, %v2311_v52  ;;  %v2302_v34 = vsel %vm5447_vm4, %v5359_v19, %v2298_v22  ;;  %v2363_v13 = vand.u32 2147483647, %v5393_v45 }
 0x794   : > { %v2388_v4 = vadd.f32 %v4015_v33, %v2387_v55  ;;  %v4023_v21 = vpop.eup %4022  ;;  %4024 = vrcp.f32 %v5430_v14  ;;  %vm2304_vm6 = vcmp.eq.f32.partialorder %v2303_v27, 8.507059e+37  ;;  %vm2315_vm7 = vweird.f32 %v5385_v40 }
 0x795   : > { %v2402_v6 = vmul.f32 %v4019_v46, %v2401_v59  ;;  %v2355_v60 = vmul.f32 %v4023_v21, %v5393_v45  ;;  %vm2360_vm5 = vweird.f32 %v4023_v21  ;;  %v2313_v42 = vadd.f32 %v5385_v40, %v2312_v28 }
 0x796   : > { %v2392_v12 = vsel %vm2391_vm14, %v4015_v33, %v2388_v4  ;;  %vm2359_vm8 = vweird.f32 %v5393_v45  ;;  %vm2314_vm9 = vweird.f32 %v5348_v8  ;;  %v2366_v47 = vor.u32 1.1754944e-38, %v2365_v35 }
 0x797   : > { %v2397_v9 = vsel %vm5417_vm13, %v2396_v17, %v2392_v12  ;;  %v2403_v20 = vadd.f32 %v4019_v46, %v2402_v6  ;;  %v2356_v33 = vsub.f32 1.0, %v2355_v60  ;;  %vm2361_vm10 = vmor %vm2359_vm8, %vm2360_vm5  ;;  %v2318_v49 = vand.u32 2147483647, %v5348_v8 }
 0x798   : > { %v2420_v23 = vmul.f32 %v2397_v9, %v5302_v24  ;;  %vm5463_vm11 = vmor %vm2314_vm9, %vm2315_vm7  ;;  %vm2364_vm12 = vcmp.eq.f32.partialorder %v2363_v13, 8.507059e+37  ;;  %v2380_v44 = vand.u32 2147483648, %v5430_v14  ;;  %v2378_v57 = vand.u32 2147483647, %v5430_v14 }
 0x799   : > { %v2407_v0 = vsel %vm2406_vm1, %v4019_v46, %v2403_v20  ;;  %v2357_v36 = vmul.f32 %v4023_v21, %v2356_v33  ;;  %v2320_v46 = vand.u32 2147483648, %v5348_v8  ;;  %v2317_v53 = vsel %vm5463_vm11, %v5385_v40, %v2313_v42 }
 0x79a   : > { %v2424_v29 = vpack.c.bf16 %v2420_v23, %v2416_v61  ;;  %v2412_v7 = vsel %vm2409_vm3, %v2411_v26, %v2407_v0  ;;  %v4025_v32 = vpop.eup %4024  ;;  %vm2319_vm14 = vcmp.eq.f32.partialorder %v2318_v49, 8.507059e+37  ;;  %vm2374_vm15 = vweird.f32 %v5430_v14 }
 0x79b   : > { %v2421_v30 = vmul.f32 %v2412_v7, %v5304_v25  ;;  %v2307_v25 = vsel %vm2304_vm6, %v2306_v51, %v2302_v34  ;;  %v2358_v41 = vadd.f32 %v4023_v21, %v2357_v36  ;;  %v2370_v19 = vmul.f32 %v4025_v32, %v5430_v14 }
 0x79c   : > { %2722 = vmatmul.bf16.vlgmr.msra.gmra.mxu0 %v2424_v29  ;;  %v2414_v45 = vmul.f32 %v2307_v25, %v5292_v15  ;;  %vm2375_vm13 = vweird.f32 %v4025_v32  ;;  %v2321_v58 = vor.u32 1.1754944e-38, %v2320_v46  ;;  %v2381_v40 = vor.u32 1.1754944e-38, %v2380_v44 }
 0x79d   : > { %v2425_v37 = vpack.c.bf16 %v2421_v30, %v2417_v31  ;;  %v2362_v50 = vsel %vm2361_vm10, %v4023_v21, %v2358_v41  ;;  %v2371_v2 = vsub.f32 1.0, %v2370_v19  ;;  %vm2376_vm0 = vmor %vm2374_vm15, %vm2375_vm13  ;;  %vm2379_vm1 = vcmp.eq.f32.partialorder %v2378_v57, 8.507059e+37 }
 0x79e   : > { %v2367_v54 = vsel %vm2364_vm12, %v2366_v47, %v2362_v50  ;;  %v2322_v15 = vsel %vm2319_vm14, %v2321_v58, %v2317_v53 }
 0x79f   : > { %2736 = vmatmul.bf16.vlgmr.msrb.gmra.mxu1 %v2425_v37  ;;  %v2418_v55 = vmul.f32 %v2367_v54, %v5316_v43  ;;  %v2372_v56 = vmul.f32 %v4025_v32, %v2371_v2  ;;  %v2415_v43 = vmul.f32 %v2322_v15, %v5296_v16 }
 0x7a1   : > { %v2422_v8 = vpack.c.bf16 %v2418_v55, %v2414_v45  ;;  %v2373_v59 = vadd.f32 %v4025_v32, %v2372_v56 }
 0x7a3   : > { %v2377_v62 = vsel %vm2376_vm0, %v4025_v32, %v2373_v59  ;;  %2694 = vmatmul.bf16.vlgmr.msra.gmra.mxu2 %v2422_v8 }
 0x7a4   : > { %v2382_v1 = vsel %vm2379_vm1, %v2381_v40, %v2377_v62 }
 0x7a5   : > { %v2419_v4 = vmul.f32 %v2382_v1, %v5342_v63 }
 0x7a7   : > { %v2423_v3 = vpack.c.bf16 %v2419_v4, %v2415_v43 }
 0x7a9   : > { %2708 = vmatmul.bf16.vlgmr.msrb.gmra.mxu3 %v2423_v3 }
 0x819   : > { %v2723_v11 = vpop.f32.mrf.mxu0 }
 0x81c   : > { %v2737_v14 = vpop.f32.mrf.mxu1 }
 0x821   : > { %v2725_v22 = vpop.f32.mrf.mxu0 }
 0x824   : > { %v2739_v26 = vpop.f32.mrf.mxu1 }
 0x826   : > { %v2695_v17 = vpop.f32.mrf.mxu2 }
 0x827   : > { %v2696_v6 = vadd.f32 %v3951_v5, %v2695_v17 }
 0x82c   : > { %v2709_v52 = vpop.f32.mrf.mxu3 }
 0x82d   : > { %v2710_v12 = vadd.f32 %v2709_v52, %v2696_v6 }
 0x82e   : > { %v2697_v61 = vpop.f32.mrf.mxu2 }
 0x82f   : > { %v2724_v18 = vadd.f32 %v2723_v11, %v2710_v12  ;;  %v2698_v20 = vadd.f32 %v3951_v5, %v2697_v61 }
 0x831   : > { %v2738_v9 = vadd.f32 %v2737_v14, %v2724_v18 }
 0x833   : > { %v2742_v21 = vadd.f32 %v2738_v9, %v5178_v38 }
 0x834   : > { %v2711_v16 = vpop.f32.mrf.mxu3 }
 0x835   : > { %2744 = vst [vmem:[#allocation2] sm:$0xff] %v2742_v21  ;;  %v2712_v63 = vadd.f32 %v2711_v16, %v2698_v20 }
 0x837   : > { %v2726_v23 = vadd.f32 %v2725_v22, %v2712_v63 }
 0x839   : > { %v2740_v0 = vadd.f32 %v2739_v26, %v2726_v23  ;;  %2750 = sbr.rel (%p3652_p2) target bundleno = 2120 (0x848), region = 160 }
 0x83b   : > { %v2743_v60 = vadd.f32 %v2740_v0, %v5182_v39 }
 0x83d   : > { %2745 = vst [vmem:[#allocation2 + $0x8] sm:$0xff] %v2743_v60 }
 0x83e   : > { %v2751_v27 = vld [vmem:[#allocation2] sm:$0xff]  ;;  %v2753_v28 = vld [vmem:[%s4970_s6] sm:$0xff] }
 0x83f   : > { %v2754_v7 = vmul.f32 %v2753_v28, %v2751_v27 }
 0x841   : > { %2756 = vst [vmem:[#allocation2] sm:$0xff] %v2754_v7 }
 0x844   : > { %v2752_v29 = vld [vmem:[#allocation2 + $0x8] sm:$0xff] }
 0x845   : > { %v2755_v31 = vmul.f32 %v2753_v28, %v2752_v29 }
 0x847   : > { %2757 = vst [vmem:[#allocation2 + $0x8] sm:$0xff] %v2755_v31 }
 0x848 PF: > { %s5601_s4 = sld [smem:[#allocation33_spill]] }
 0x84e   : > { %p3653_p3 = scmp.ne.s32.totalorder %s5601_s4, 2 }
 0x84f   : > { %s2765_s23 = sld [smem:[#allocation4]] (!%p3653_p3) }
 0x850   : > { %2761 = sbr.rel (%p3653_p3) target bundleno = 2556 (0x9fc), region = 164  ;;  %s3654_s29 = sld [smem:[#allocation4 + $0x1]] (!%p3653_p3) }
 0x851   : > { %s5602_s5 = sld [smem:[#allocation46_spill]] (!%p3653_p3) }
 0x852   : > { %s5603_s0 = sld [smem:[#allocation47_spill]] (!%p3653_p3) }
 0x855   : > { %v2766_v38 = vlaneseq  ;;  %v2762_v39 = vld [vmem:[#allocation2] sm:$0xff]  ;;  %v2763_v30 = vld [vmem:[#allocation2 + $0x8] sm:$0xff]  ;;  %v2768_v33 = vstv %s2765_s23  ;;  %vm2792_vm4 = vcmask 1040384   ;;  %vm2796_vm5 = vcmask 1041408   ;;  %v3796_v57 = vld [vmem:[#allocation24 + $0x30] sm:$0xff] }
 0x856   : > { %v2781_v34 = vstv %s3654_s29  ;;  %v3797_v45 = vld [vmem:[#allocation24 + $0x38] sm:$0xff]  ;;  %v3795_v58 = vld [vmem:[#allocation24 + $0x28] sm:$0xff]  ;;  %v3794_v8 = vld [vmem:[#allocation24 + $0x20] sm:$0xff] }
 0x857   : > { %v2767_v24 = vshrl.u32 %v2766_v38, 7  ;;  %2892 = vmatpush.bf16.msra.mxu0 %v3797_v45  ;;  %v3793_v59 = vld [vmem:[#allocation24 + $0x18] sm:$0xff]  ;;  %v3792_v15 = vld [vmem:[#allocation24 + $0x10] sm:$0xff]  ;;  %v3791_v40 = vld [vmem:[#allocation24 + $0x8] sm:$0xff] }
 0x858   : > { %v3790_v62 = vld [vmem:[#allocation24] sm:$0xff]  ;;  %v4026_v12 = vld [vmem:[%s5602_s5] ss:$0 sm:$0xff] }
 0x859   : > { %vm2769_vm2 = vcmp.eq.s32.totalorder %v2767_v24, %v2768_v33  ;;  %vm2782_vm3 = vcmp.eq.s32.totalorder %v2767_v24, %v2781_v34 }
 0x85a   : > { %v2772_v51 = vsel %vm2769_vm2, %v2762_v39, 0.0  ;;  %v2785_v37 = vsel %vm2782_vm3, %v2763_v30, 0.0 }
 0x85b   : > { %v2773_v35 = vrot.slane %v2772_v51, 4  ;;  %v2786_v36 = vrot.slane %v2785_v37, 4  ;;  %2893 = vmatpush.bf16.msra.mxu0 %v3796_v57 }
 0x85d   : > { %v2774_v13 = vadd.f32 %v2773_v35, %v2772_v51  ;;  %v2787_v32 = vadd.f32 %v2786_v36, %v2785_v37 }
 0x85f   : > { %v2775_v42 = vrot.slane %v2774_v13, 2  ;;  %v2788_v25 = vrot.slane %v2787_v32, 2  ;;  %2894 = vmatpush.bf16.msra.mxu0 %v3795_v58 }
 0x861   : > { %v2776_v41 = vadd.f32 %v2775_v42, %v2774_v13  ;;  %v2789_v19 = vadd.f32 %v2788_v25, %v2787_v32 }
 0x863   : > { %v2777_v46 = vrot.slane %v2776_v41, 1  ;;  %v2790_v47 = vrot.slane %v2789_v19, 1  ;;  %2895 = vmatpush.bf16.msra.mxu0 %v3794_v8 }
 0x865   : > { %v2778_v48 = vadd.f32 %v2777_v46, %v2776_v41  ;;  %v2791_v49 = vadd.f32 %v2790_v47, %v2789_v19 }
 0x867   : > { %v2793_v50 = vsel %vm2792_vm4, %v2778_v48, %v2791_v49  ;;  %2896 = vmatpush.bf16.msra.mxu0 %v3793_v59 }
 0x868   : > { %v2797_v2 = vsel %vm2796_vm5, %v2793_v50, 0.0 }
 0x869   : > { %2798 = vadd.xlane.f32.xlu0 %v2797_v2 }
 0x86b   : > { %2897 = vmatpush.bf16.msra.mxu0 %v3792_v15 }
 0x86f   : > { %2898 = vmatpush.bf16.msra.mxu0 %v3791_v40 }
 0x873   : > { %2899 = vmatpush.bf16.msra.mxu0 %v3790_v62 }
 0x8dc   : > { %v2799_v53 = vpop.xlane.xlu0 %2798 }
 0x8dd   : > { %v2800_v54 = vmul.f32 %v2799_v53, %v4979_v10 }
 0x8df   : > { %v2801_v44 = vsub.f32 %v2793_v50, %v2800_v54 }
 0x8e1   : > { %v2802_v55 = vmul.f32 %v2801_v44, %v2801_v44 }
 0x8e3   : > { %v2803_v56 = vsel %vm2796_vm5, %v2802_v55, 0.0 }
 0x8e4   : > { %2804 = vadd.xlane.f32.xlu0 %v2803_v56 }
 0x957   : > { %v2805_v1 = vpop.xlane.xlu0 %2804 }
 0x958   : > { %v2806_v43 = vmul.f32 %v2805_v1, %v4979_v10  ;;  %v4027_v10 = vld [vmem:[%s5603_s0] ss:$0 sm:$0xff] }
 0x95a   : > { %v2807_v4 = vadd.f32 1e-05, %v2806_v43 }
 0x95c   : > { %4028 = vrsqrt.f32 %v2807_v4  ;;  %vm2814_vm7 = vweird.f32 %v2807_v4 }
 0x962   : > { %v4029_v3 = vpop.eup %4028 }
 0x963   : > { %v2809_v5 = vmul.f32 %v4029_v3, %v2807_v4  ;;  %vm2815_vm6 = vweird.f32 %v4029_v3 }
 0x964   : > { %vm2816_vm8 = vmor %vm2814_vm7, %vm2815_vm6 }
 0x965   : > { %v2810_v17 = vmul.f32 %v4029_v3, %v2809_v5 }
 0x967   : > { %v2811_v6 = vmul.f32 0.5, %v2810_v17 }
 0x969   : > { %v2812_v11 = vsub.f32 1.5, %v2811_v6 }
 0x96b   : > { %v2813_v52 = vmul.f32 %v4029_v3, %v2812_v11 }
 0x96d   : > { %v2817_v14 = vsel %vm2816_vm8, %v4029_v3, %v2813_v52 }
 0x96e   : > { %v2818_v61 = vmul.f32 %v2817_v14, %v2801_v44 }
 0x970   : > { %v2822_v18 = vmul.f32 %v4026_v12, %v2818_v61 }
 0x972   : > { %v2826_v9 = vadd.f32 %v4027_v10, %v2822_v18 }
 0x974   : > { %v2827_v20 = vpack.c.bf16 %v2826_v9, %v2826_v9 }
 0x976   : > { %2900 = vmatmul.bf16.vlgmr.msra.gmra.mxu0 %v2827_v20 }
 0x9f3   : > { %v2901_v21 = vpop.f32.mrf.mxu0 }
 0x9f4   : > { %2905 = vst [vmem:[#allocation25] sm:$0x3] %v2901_v21 }
 0x9fb   : > { %v2903_v16 = vpop.f32.mrf.mxu0 }
 0x9fc PF: > { %s5604_s30 = sld [smem:[#allocation34_spill]]  ;;  %s4610_s28 = smov [#allocation25]  }
 0x9fd   : > { %s5605_s8 = sld [smem:[#allocation49_spill]]  ;;  %s2914_s3 = sshll.u32 %s4610_s28, 4  ;;  %s2915_s3 = int_to_ptr.vmem [resolvable:$true] %s2914_s3 }
 0xa02   : > { %p3860_p4 = scmp.eq.s32.totalorder %s5604_s30, 2 }
 0xa03   : > { %s2916_s25 = sshll.u32 %s5605_s8, 4  ;;  %s2917_s25 = int_to_ptr.hbm [resolvable:$true] %s2916_s25 }
 0xa04   : > { %3841 = dma.vmem_to_hbm [thread:$0]  (%p3860_p4), %s2915_s3, 32, %s2917_s25, [#allocation9]  }
 0xa05   : > { %4563 = dma.done.wait (%p3860_p4), [#allocation9], 32  }
 0xa06   : > { %4565 = vsyncadd (%p3860_p4), [#allocation9], 4294967264 }
 0xa07 PF: > { %s52_s2 = sadd.s32 1, %s4588_s2   ;;  %s5606_s1 = sld [smem:[#allocation32_spill]] }
 0xa08   : > { %p49_p5 = scmp.ge.s32.totalorder %s52_s2, 5   ;;  %s5607_s20 = sld [smem:[#allocation37_spill]] }
 0xa09   : > { %s5608_s19 = sld [smem:[#allocation35_spill]]  ;;  %s5609_s23 = smov %s4576_s17 }
 0xa0a   : > { %s5611_s3 = smov %s4584_s24 }
 0xa0b   :  { %51 = sbr.rel (!%p49_p5) target bundleno = 31 (0x1f), region = 278 }
 0xa0e   : > { %s5610_s17 = smov %s5607_s20 }
 0xa0f   : > { %s5612_s24 = smov %s5608_s19 }
 0xa10   :  { %2930 = vsyncpa [#allocation8], 1 }
 0xa11   :  { %2932 = vsyncpa [#allocation8 + $0x1], 1 }
 0xa12   :  { %2933 = vsyncpa [#allocation11], 1 }
 0xa13   :  { %2934 = vsyncpa [#allocation9], 1 }
 0xa14   :  { %2936 = vsyncpa [#allocation9 + $0x1], 1 }

</bundles_post_ra>
